<compile_context>
chip_gen: v6e
topology: v6e:2x2x1
jax: 0.10.0
libtpu: 0.0.40
codegen_flags: <defaults>
</compile_context>

<pallas_src>
import jax
import jax.numpy as jnp
from jax import lax
from jax.experimental import pallas as pl
from jax.experimental.pallas import tpu as pltpu


def lstm_kernel(x_ref,              # (seq*B, D)      time-major, batch-padded
                wih0_ref,           # (D, 4H)
                whh0_ref,           # (H, 4H)
                b0_ref,             # (1, 4H)  = bias_ih_l0 + bias_hh_l0
                wih1_ref,           # (H, 4H)
                whh1_ref,           # (H, 4H)
                b1_ref,             # (1, 4H)  = bias_ih_l1 + bias_hh_l1
                h_out_ref,          # (B, H)   h of last step, top layer
                gx0_ref,            # scratch (seq, B, 4H)
                hhist_ref,          # scratch (seq, B, H)
                gx1_ref):           # scratch (seq, B, 4H)
    seq, B, fourH = gx0_ref.shape
    H = whh0_ref.shape[0]

    # Precomputed (hoisted) lane mask selecting the 'g' (cell-candidate) block.
    lane = lax.broadcasted_iota(jnp.int32, (B, fourH), 1)
    g_mask = (lane >= 2 * H) & (lane < 3 * H)

    def cell(gates_x, h, c, whh_ref):
        # One matmul per cell per step; x-projection + bias already folded in.
        gates = gates_x + jnp.dot(h, whh_ref[...],
                                  preferred_element_type=jnp.float32)
        # Activate the whole (B, 4H) vreg once; tanh only on the 'g' block.
        act = jnp.where(g_mask, jnp.tanh(gates), jax.nn.sigmoid(gates))
        i = act[:, 0 * H:1 * H]
        f = act[:, 1 * H:2 * H]
        g = act[:, 2 * H:3 * H]
        o = act[:, 3 * H:4 * H]
        c_new = f * c + i * g
        h_new = o * jnp.tanh(c_new)
        return h_new, c_new

    zeros = jnp.zeros((B, H), jnp.float32)

    # ---- Phase 1: layer-0 input projection for ALL steps (one matmul). ----
    gx0 = (jnp.dot(x_ref[...], wih0_ref[...],
                   preferred_element_type=jnp.float32) + b0_ref[...])
    gx0_ref[...] = gx0.reshape(seq, B, fourH)

    # ---- Phase 2: layer-0 recurrence; h/c in registers, h history to VMEM. -
    def body0(t, carry):
        h, c = carry
        h, c = cell(gx0_ref[t], h, c, whh0_ref)
        hhist_ref[t] = h
        return (h, c)

    lax.fori_loop(0, seq, body0, (zeros, zeros), unroll=True)

    # ---- Phase 3: layer-1 input projection for ALL steps (one matmul). ----
    h_all = hhist_ref[...].reshape(seq * B, H)
    gx1 = (jnp.dot(h_all, wih1_ref[...],
                   preferred_element_type=jnp.float32) + b1_ref[...])
    gx1_ref[...] = gx1.reshape(seq, B, fourH)

    # ---- Phase 4: layer-1 recurrence; only the final h is needed. ----------
    def body1(t, carry):
        h, c = carry
        return cell(gx1_ref[t], h, c, whh1_ref)

    h1, _ = lax.fori_loop(0, seq, body1, (zeros, zeros), unroll=True)
    h_out_ref[...] = h1


def lstm_forward(x, params):
    """x: (seq, B, D) float32 -> (B,) float32 (matches y_pred.view(-1))."""
    seq, B, D = x.shape
    H = params["weight_hh_l0"].shape[1]

    # Pad batch to a sublane multiple (8); padded rows are discarded at the end.
    B_pad = ((B + 7) // 8) * 8
    if B_pad != B:
        x = jnp.pad(x, ((0, 0), (0, B_pad - B), (0, 0)))
    x2d = x.reshape(seq * B_pad, D)          # contiguous -> free reshape

    # Pre-transpose / combine weights (plain-JAX glue).
    wih0 = params["weight_ih_l0"].T                              # (D, 4H)
    whh0 = params["weight_hh_l0"].T                              # (H, 4H)
    b0 = (params["bias_ih_l0"] + params["bias_hh_l0"]).reshape(1, 4 * H)
    wih1 = params["weight_ih_l1"].T                              # (H, 4H)
    whh1 = params["weight_hh_l1"].T                              # (H, 4H)
    b1 = (params["bias_ih_l1"] + params["bias_hh_l1"]).reshape(1, 4 * H)

    # Single kernel invocation (no grid); everything is VMEM-resident.
    h_last = pl.pallas_call(
        lstm_kernel,
        out_shape=jax.ShapeDtypeStruct((B_pad, H), jnp.float32),
        scratch_shapes=[
            pltpu.VMEM((seq, B_pad, 4 * H), jnp.float32),   # gx0
            pltpu.VMEM((seq, B_pad, H), jnp.float32),       # h0 history
            pltpu.VMEM((seq, B_pad, 4 * H), jnp.float32),   # gx1
        ],
    )(x2d, wih0, whh0, b0, wih1, whh1, b1)

    # Linear(H -> 1) head on the lane-dense kernel output (wrapper glue).
    y = h_last[:B] @ params["linear_w"].T + params["linear_b"]
    return y.reshape(-1)


def lstm_ref(x, params):
    """Pure-JAX reference of the PyTorch forward, for correctness check."""
    seq, B, D = x.shape
    H = params["weight_hh_l0"].shape[1]

    def cell(x_in, h, c, wih, whh, bih, bhh):
        gates = x_in @ wih.T + bih + h @ whh.T + bhh
        i = jax.nn.sigmoid(gates[:, 0 * H:1 * H])
        f = jax.nn.sigmoid(gates[:, 1 * H:2 * H])
        g = jnp.tanh(gates[:, 2 * H:3 * H])
        o = jax.nn.sigmoid(gates[:, 3 * H:4 * H])
        c = f * c + i * g
        h = o * jnp.tanh(c)
        return h, c

    h0 = jnp.zeros((B, H)); c0 = jnp.zeros((B, H))
    h1 = jnp.zeros((B, H)); c1 = jnp.zeros((B, H))
    for t in range(seq):
        h0, c0 = cell(x[t], h0, c0, params["weight_ih_l0"],
                      params["weight_hh_l0"], params["bias_ih_l0"],
                      params["bias_hh_l0"])
        h1, c1 = cell(h0, h1, c1, params["weight_ih_l1"],
                      params["weight_hh_l1"], params["bias_ih_l1"],
                      params["bias_hh_l1"])
    y = h1 @ params["linear_w"].T + params["linear_b"]
    return y.reshape(-1)


def init_params(key, input_dim, hidden_dim, output_dim=1):
    """Deterministic uniform(-1/sqrt(H), 1/sqrt(H)) init (PyTorch-style)."""
    H, D = hidden_dim, input_dim
    stdv = 1.0 / jnp.sqrt(jnp.float32(H))
    keys = jax.random.split(key, 10)
    u = lambda k, shape: jax.random.uniform(k, shape, jnp.float32, -stdv, stdv)
    return {
        "weight_ih_l0": u(keys[0], (4 * H, D)),
        "weight_hh_l0": u(keys[1], (4 * H, H)),
        "bias_ih_l0":   u(keys[2], (4 * H,)),
        "bias_hh_l0":   u(keys[3], (4 * H,)),
        "weight_ih_l1": u(keys[4], (4 * H, H)),
        "weight_hh_l1": u(keys[5], (4 * H, H)),
        "bias_ih_l1":   u(keys[6], (4 * H,)),
        "bias_hh_l1":   u(keys[7], (4 * H,)),
        "linear_w":     u(keys[8], (output_dim, H)),
        "linear_b":     u(keys[9], (output_dim,)),
    }


if __name__ == "__main__":
    seq_len, batch, input_dim, hidden_dim = 8, 4, 8, 32

    key = jax.random.PRNGKey(0)
    k_x, k_p = jax.random.split(key)
    x = jax.random.normal(k_x, (seq_len, batch, input_dim), jnp.float32)
    params = init_params(k_p, input_dim, hidden_dim)

    y = lstm_forward(x, params)
    y = jax.block_until_ready(y)

    y_ref = lstm_ref(x, params)
    assert y.shape == (batch,)
    assert jnp.allclose(y, y_ref, atol=1e-5, rtol=1e-5), (y, y_ref)

    print("KERNEL_OK")
</pallas_src>

<mosaic_0001>
module attributes {stable_mosaic.version = 11 : i64} {
  func.func @lstm_kernel(%arg0: memref<64x8xf32, #tpu.memory_space<vmem>>, %arg1: memref<8x128xf32, #tpu.memory_space<vmem>>, %arg2: memref<32x128xf32, #tpu.memory_space<vmem>>, %arg3: memref<1x128xf32, #tpu.memory_space<vmem>>, %arg4: memref<32x128xf32, #tpu.memory_space<vmem>>, %arg5: memref<32x128xf32, #tpu.memory_space<vmem>>, %arg6: memref<1x128xf32, #tpu.memory_space<vmem>>, %arg7: memref<8x32xf32, #tpu.memory_space<vmem>>, %arg8: memref<8x8x128xf32, #tpu.memory_space<vmem>>, %arg9: memref<8x8x32xf32, #tpu.memory_space<vmem>>, %arg10: memref<8x8x128xf32, #tpu.memory_space<vmem>>) attributes {dimension_semantics = [], scalar_prefetch = 0 : i64, scratch_operands = 3 : i64, tpu.core_type = #tpu.core_type<tc>} {
    %0 = tpu.iota {dimensions = array<i32: 1>} : vector<8x128xi32>
    %c64_i32 = arith.constant 64 : i32
    %1 = vector.broadcast %c64_i32 : i32 to vector<8x128xi32>
    %2 = arith.cmpi sge, %0, %1 : vector<8x128xi32>
    %c96_i32 = arith.constant 96 : i32
    %3 = vector.broadcast %c96_i32 : i32 to vector<8x128xi32>
    %4 = arith.cmpi slt, %0, %3 : vector<8x128xi32>
    %5 = arith.andi %2, %4 : vector<8x128xi1>
    %cst = arith.constant 0.000000e+00 : f32
    %6 = vector.broadcast %cst : f32 to vector<8x32xf32>
    %c0 = arith.constant 0 : index
    %c0_0 = arith.constant 0 : index
    %7 = vector.load %arg0[%c0, %c0_0] : memref<64x8xf32, #tpu.memory_space<vmem>>, vector<64x8xf32>
    %c0_1 = arith.constant 0 : index
    %c0_2 = arith.constant 0 : index
    %8 = vector.load %arg1[%c0_1, %c0_2] : memref<8x128xf32, #tpu.memory_space<vmem>>, vector<8x128xf32>
    %cst_3 = arith.constant dense<0.000000e+00> : vector<64x128xf32>
    %9 = tpu.matmul %7, %8, %cst_3 {dimension_numbers = #tpu.dot_dimension_numbers<[1], [0], [0], [1], [0, 0, 1, 1], [], []>} : vector<64x8xf32>, vector<8x128xf32>, vector<64x128xf32> -> vector<64x128xf32>
    %c0_4 = arith.constant 0 : index
    %c0_5 = arith.constant 0 : index
    %10 = vector.load %arg3[%c0_4, %c0_5] : memref<1x128xf32, #tpu.memory_space<vmem>>, vector<1x128xf32>
    %11 = vector.broadcast %10 : vector<1x128xf32> to vector<64x128xf32>
    %12 = arith.addf %9, %11 : vector<64x128xf32>
    %13 = vector.shape_cast %12 : vector<64x128xf32> to vector<8x8x128xf32>
    %c0_6 = arith.constant 0 : index
    %c0_7 = arith.constant 0 : index
    %c0_8 = arith.constant 0 : index
    %14 = vector.load %arg8[%c0_6, %c0_7, %c0_8] : memref<8x8x128xf32, #tpu.memory_space<vmem>>, vector<8x8x128xf32>
    tpu.vector_store %arg8[%c0_6, %c0_7, %c0_8], %13 {strides = array<i32>} : memref<8x8x128xf32, #tpu.memory_space<vmem>>, vector<8x8x128xf32>,
    %c0_i32 = arith.constant 0 : i32
    %15 = arith.index_cast %c0_i32 : i32 to index
    %c0_9 = arith.constant 0 : index
    %c0_10 = arith.constant 0 : index
    %16 = vector.load %arg8[%15, %c0_9, %c0_10] : memref<8x8x128xf32, #tpu.memory_space<vmem>>, vector<1x8x128xf32>
    %17 = vector.shape_cast %16 : vector<1x8x128xf32> to vector<8x128xf32>
    %c0_11 = arith.constant 0 : index
    %c0_12 = arith.constant 0 : index
    %18 = vector.load %arg2[%c0_11, %c0_12] : memref<32x128xf32, #tpu.memory_space<vmem>>, vector<32x128xf32>
    %cst_13 = arith.constant dense<0.000000e+00> : vector<8x128xf32>
    %19 = tpu.matmul %6, %18, %cst_13 {dimension_numbers = #tpu.dot_dimension_numbers<[1], [0], [0], [1], [0, 0, 1, 1], [], []>} : vector<8x32xf32>, vector<32x128xf32>, vector<8x128xf32> -> vector<8x128xf32>
    %20 = arith.addf %17, %19 : vector<8x128xf32>
    %21 = math.tanh %20 : vector<8x128xf32>
    %22 = arith.negf %20 : vector<8x128xf32>
    %23 = math.exp %22 : vector<8x128xf32>
    %cst_14 = arith.constant 1.000000e+00 : f32
    %24 = vector.broadcast %cst_14 : f32 to vector<8x128xf32>
    %25 = arith.addf %24, %23 : vector<8x128xf32>
    %26 = arith.divf %24, %25 : vector<8x128xf32>
    %27 = arith.select %5, %21, %26 : vector<8x128xi1>, vector<8x128xf32>
    %28 = vector.extract_strided_slice %27 {offsets = [0, 0], sizes = [8, 32], strides = [1, 1]} : vector<8x128xf32> to vector<8x32xf32>
    %29 = vector.extract_strided_slice %27 {offsets = [0, 32], sizes = [8, 32], strides = [1, 1]} : vector<8x128xf32> to vector<8x32xf32>
    %30 = vector.extract_strided_slice %27 {offsets = [0, 64], sizes = [8, 32], strides = [1, 1]} : vector<8x128xf32> to vector<8x32xf32>
    %31 = vector.extract_strided_slice %27 {offsets = [0, 96], sizes = [8, 32], strides = [1, 1]} : vector<8x128xf32> to vector<8x32xf32>
    %32 = arith.mulf %29, %6 : vector<8x32xf32>
    %33 = arith.mulf %28, %30 : vector<8x32xf32>
    %34 = arith.addf %32, %33 : vector<8x32xf32>
    %35 = math.tanh %34 : vector<8x32xf32>
    %36 = arith.mulf %31, %35 : vector<8x32xf32>
    %37 = arith.index_cast %c0_i32 : i32 to index
    %c0_15 = arith.constant 0 : index
    %c0_16 = arith.constant 0 : index
    %38 = vector.load %arg9[%37, %c0_15, %c0_16] : memref<8x8x32xf32, #tpu.memory_space<vmem>>, vector<1x8x32xf32>
    %39 = vector.shape_cast %38 : vector<1x8x32xf32> to vector<8x32xf32>
    %40 = vector.shape_cast %36 : vector<8x32xf32> to vector<1x8x32xf32>
    tpu.vector_store %arg9[%37, %c0_15, %c0_16], %40 {strides = array<i32>} : memref<8x8x32xf32, #tpu.memory_space<vmem>>, vector<1x8x32xf32>,
    %c1_i32 = arith.constant 1 : i32
    %41 = arith.index_cast %c1_i32 : i32 to index
    %c0_17 = arith.constant 0 : index
    %c0_18 = arith.constant 0 : index
    %42 = vector.load %arg8[%41, %c0_17, %c0_18] : memref<8x8x128xf32, #tpu.memory_space<vmem>>, vector<1x8x128xf32>
    %43 = vector.shape_cast %42 : vector<1x8x128xf32> to vector<8x128xf32>
    %c0_19 = arith.constant 0 : index
    %c0_20 = arith.constant 0 : index
    %44 = vector.load %arg2[%c0_19, %c0_20] : memref<32x128xf32, #tpu.memory_space<vmem>>, vector<32x128xf32>
    %cst_21 = arith.constant dense<0.000000e+00> : vector<8x128xf32>
    %45 = tpu.matmul %36, %44, %cst_21 {dimension_numbers = #tpu.dot_dimension_numbers<[1], [0], [0], [1], [0, 0, 1, 1], [], []>} : vector<8x32xf32>, vector<32x128xf32>, vector<8x128xf32> -> vector<8x128xf32>
    %46 = arith.addf %43, %45 : vector<8x128xf32>
    %47 = math.tanh %46 : vector<8x128xf32>
    %48 = arith.negf %46 : vector<8x128xf32>
    %49 = math.exp %48 : vector<8x128xf32>
    %cst_22 = arith.constant 1.000000e+00 : f32
    %50 = vector.broadcast %cst_22 : f32 to vector<8x128xf32>
    %51 = arith.addf %50, %49 : vector<8x128xf32>
    %52 = arith.divf %50, %51 : vector<8x128xf32>
    %53 = arith.select %5, %47, %52 : vector<8x128xi1>, vector<8x128xf32>
    %54 = vector.extract_strided_slice %53 {offsets = [0, 0], sizes = [8, 32], strides = [1, 1]} : vector<8x128xf32> to vector<8x32xf32>
    %55 = vector.extract_strided_slice %53 {offsets = [0, 32], sizes = [8, 32], strides = [1, 1]} : vector<8x128xf32> to vector<8x32xf32>
    %56 = vector.extract_strided_slice %53 {offsets = [0, 64], sizes = [8, 32], strides = [1, 1]} : vector<8x128xf32> to vector<8x32xf32>
    %57 = vector.extract_strided_slice %53 {offsets = [0, 96], sizes = [8, 32], strides = [1, 1]} : vector<8x128xf32> to vector<8x32xf32>
    %58 = arith.mulf %55, %34 : vector<8x32xf32>
    %59 = arith.mulf %54, %56 : vector<8x32xf32>
    %60 = arith.addf %58, %59 : vector<8x32xf32>
    %61 = math.tanh %60 : vector<8x32xf32>
    %62 = arith.mulf %57, %61 : vector<8x32xf32>
    %63 = arith.index_cast %c1_i32 : i32 to index
    %c0_23 = arith.constant 0 : index
    %c0_24 = arith.constant 0 : index
    %64 = vector.load %arg9[%63, %c0_23, %c0_24] : memref<8x8x32xf32, #tpu.memory_space<vmem>>, vector<1x8x32xf32>
    %65 = vector.shape_cast %64 : vector<1x8x32xf32> to vector<8x32xf32>
    %66 = vector.shape_cast %62 : vector<8x32xf32> to vector<1x8x32xf32>
    tpu.vector_store %arg9[%63, %c0_23, %c0_24], %66 {strides = array<i32>} : memref<8x8x32xf32, #tpu.memory_space<vmem>>, vector<1x8x32xf32>,
    %c2_i32 = arith.constant 2 : i32
    %67 = arith.index_cast %c2_i32 : i32 to index
    %c0_25 = arith.constant 0 : index
    %c0_26 = arith.constant 0 : index
    %68 = vector.load %arg8[%67, %c0_25, %c0_26] : memref<8x8x128xf32, #tpu.memory_space<vmem>>, vector<1x8x128xf32>
    %69 = vector.shape_cast %68 : vector<1x8x128xf32> to vector<8x128xf32>
    %c0_27 = arith.constant 0 : index
    %c0_28 = arith.constant 0 : index
    %70 = vector.load %arg2[%c0_27, %c0_28] : memref<32x128xf32, #tpu.memory_space<vmem>>, vector<32x128xf32>
    %cst_29 = arith.constant dense<0.000000e+00> : vector<8x128xf32>
    %71 = tpu.matmul %62, %70, %cst_29 {dimension_numbers = #tpu.dot_dimension_numbers<[1], [0], [0], [1], [0, 0, 1, 1], [], []>} : vector<8x32xf32>, vector<32x128xf32>, vector<8x128xf32> -> vector<8x128xf32>
    %72 = arith.addf %69, %71 : vector<8x128xf32>
    %73 = math.tanh %72 : vector<8x128xf32>
    %74 = arith.negf %72 : vector<8x128xf32>
    %75 = math.exp %74 : vector<8x128xf32>
    %cst_30 = arith.constant 1.000000e+00 : f32
    %76 = vector.broadcast %cst_30 : f32 to vector<8x128xf32>
    %77 = arith.addf %76, %75 : vector<8x128xf32>
    %78 = arith.divf %76, %77 : vector<8x128xf32>
    %79 = arith.select %5, %73, %78 : vector<8x128xi1>, vector<8x128xf32>
    %80 = vector.extract_strided_slice %79 {offsets = [0, 0], sizes = [8, 32], strides = [1, 1]} : vector<8x128xf32> to vector<8x32xf32>
    %81 = vector.extract_strided_slice %79 {offsets = [0, 32], sizes = [8, 32], strides = [1, 1]} : vector<8x128xf32> to vector<8x32xf32>
    %82 = vector.extract_strided_slice %79 {offsets = [0, 64], sizes = [8, 32], strides = [1, 1]} : vector<8x128xf32> to vector<8x32xf32>
    %83 = vector.extract_strided_slice %79 {offsets = [0, 96], sizes = [8, 32], strides = [1, 1]} : vector<8x128xf32> to vector<8x32xf32>
    %84 = arith.mulf %81, %60 : vector<8x32xf32>
    %85 = arith.mulf %80, %82 : vector<8x32xf32>
    %86 = arith.addf %84, %85 : vector<8x32xf32>
    %87 = math.tanh %86 : vector<8x32xf32>
    %88 = arith.mulf %83, %87 : vector<8x32xf32>
    %89 = arith.index_cast %c2_i32 : i32 to index
    %c0_31 = arith.constant 0 : index
    %c0_32 = arith.constant 0 : index
    %90 = vector.load %arg9[%89, %c0_31, %c0_32] : memref<8x8x32xf32, #tpu.memory_space<vmem>>, vector<1x8x32xf32>
    %91 = vector.shape_cast %90 : vector<1x8x32xf32> to vector<8x32xf32>
    %92 = vector.shape_cast %88 : vector<8x32xf32> to vector<1x8x32xf32>
    tpu.vector_store %arg9[%89, %c0_31, %c0_32], %92 {strides = array<i32>} : memref<8x8x32xf32, #tpu.memory_space<vmem>>, vector<1x8x32xf32>,
    %c3_i32 = arith.constant 3 : i32
    %93 = arith.index_cast %c3_i32 : i32 to index
    %c0_33 = arith.constant 0 : index
    %c0_34 = arith.constant 0 : index
    %94 = vector.load %arg8[%93, %c0_33, %c0_34] : memref<8x8x128xf32, #tpu.memory_space<vmem>>, vector<1x8x128xf32>
    %95 = vector.shape_cast %94 : vector<1x8x128xf32> to vector<8x128xf32>
    %c0_35 = arith.constant 0 : index
    %c0_36 = arith.constant 0 : index
    %96 = vector.load %arg2[%c0_35, %c0_36] : memref<32x128xf32, #tpu.memory_space<vmem>>, vector<32x128xf32>
    %cst_37 = arith.constant dense<0.000000e+00> : vector<8x128xf32>
    %97 = tpu.matmul %88, %96, %cst_37 {dimension_numbers = #tpu.dot_dimension_numbers<[1], [0], [0], [1], [0, 0, 1, 1], [], []>} : vector<8x32xf32>, vector<32x128xf32>, vector<8x128xf32> -> vector<8x128xf32>
    %98 = arith.addf %95, %97 : vector<8x128xf32>
    %99 = math.tanh %98 : vector<8x128xf32>
    %100 = arith.negf %98 : vector<8x128xf32>
    %101 = math.exp %100 : vector<8x128xf32>
    %cst_38 = arith.constant 1.000000e+00 : f32
    %102 = vector.broadcast %cst_38 : f32 to vector<8x128xf32>
    %103 = arith.addf %102, %101 : vector<8x128xf32>
    %104 = arith.divf %102, %103 : vector<8x128xf32>
    %105 = arith.select %5, %99, %104 : vector<8x128xi1>, vector<8x128xf32>
    %106 = vector.extract_strided_slice %105 {offsets = [0, 0], sizes = [8, 32], strides = [1, 1]} : vector<8x128xf32> to vector<8x32xf32>
    %107 = vector.extract_strided_slice %105 {offsets = [0, 32], sizes = [8, 32], strides = [1, 1]} : vector<8x128xf32> to vector<8x32xf32>
    %108 = vector.extract_strided_slice %105 {offsets = [0, 64], sizes = [8, 32], strides = [1, 1]} : vector<8x128xf32> to vector<8x32xf32>
    %109 = vector.extract_strided_slice %105 {offsets = [0, 96], sizes = [8, 32], strides = [1, 1]} : vector<8x128xf32> to vector<8x32xf32>
    %110 = arith.mulf %107, %86 : vector<8x32xf32>
    %111 = arith.mulf %106, %108 : vector<8x32xf32>
    %112 = arith.addf %110, %111 : vector<8x32xf32>
    %113 = math.tanh %112 : vector<8x32xf32>
    %114 = arith.mulf %109, %113 : vector<8x32xf32>
    %115 = arith.index_cast %c3_i32 : i32 to index
    %c0_39 = arith.constant 0 : index
    %c0_40 = arith.constant 0 : index
    %116 = vector.load %arg9[%115, %c0_39, %c0_40] : memref<8x8x32xf32, #tpu.memory_space<vmem>>, vector<1x8x32xf32>
    %117 = vector.shape_cast %116 : vector<1x8x32xf32> to vector<8x32xf32>
    %118 = vector.shape_cast %114 : vector<8x32xf32> to vector<1x8x32xf32>
    tpu.vector_store %arg9[%115, %c0_39, %c0_40], %118 {strides = array<i32>} : memref<8x8x32xf32, #tpu.memory_space<vmem>>, vector<1x8x32xf32>,
    %c4_i32 = arith.constant 4 : i32
    %119 = arith.index_cast %c4_i32 : i32 to index
    %c0_41 = arith.constant 0 : index
    %c0_42 = arith.constant 0 : index
    %120 = vector.load %arg8[%119, %c0_41, %c0_42] : memref<8x8x128xf32, #tpu.memory_space<vmem>>, vector<1x8x128xf32>
    %121 = vector.shape_cast %120 : vector<1x8x128xf32> to vector<8x128xf32>
    %c0_43 = arith.constant 0 : index
    %c0_44 = arith.constant 0 : index
    %122 = vector.load %arg2[%c0_43, %c0_44] : memref<32x128xf32, #tpu.memory_space<vmem>>, vector<32x128xf32>
    %cst_45 = arith.constant dense<0.000000e+00> : vector<8x128xf32>
    %123 = tpu.matmul %114, %122, %cst_45 {dimension_numbers = #tpu.dot_dimension_numbers<[1], [0], [0], [1], [0, 0, 1, 1], [], []>} : vector<8x32xf32>, vector<32x128xf32>, vector<8x128xf32> -> vector<8x128xf32>
    %124 = arith.addf %121, %123 : vector<8x128xf32>
    %125 = math.tanh %124 : vector<8x128xf32>
    %126 = arith.negf %124 : vector<8x128xf32>
    %127 = math.exp %126 : vector<8x128xf32>
    %cst_46 = arith.constant 1.000000e+00 : f32
    %128 = vector.broadcast %cst_46 : f32 to vector<8x128xf32>
    %129 = arith.addf %128, %127 : vector<8x128xf32>
    %130 = arith.divf %128, %129 : vector<8x128xf32>
    %131 = arith.select %5, %125, %130 : vector<8x128xi1>, vector<8x128xf32>
    %132 = vector.extract_strided_slice %131 {offsets = [0, 0], sizes = [8, 32], strides = [1, 1]} : vector<8x128xf32> to vector<8x32xf32>
    %133 = vector.extract_strided_slice %131 {offsets = [0, 32], sizes = [8, 32], strides = [1, 1]} : vector<8x128xf32> to vector<8x32xf32>
    %134 = vector.extract_strided_slice %131 {offsets = [0, 64], sizes = [8, 32], strides = [1, 1]} : vector<8x128xf32> to vector<8x32xf32>
    %135 = vector.extract_strided_slice %131 {offsets = [0, 96], sizes = [8, 32], strides = [1, 1]} : vector<8x128xf32> to vector<8x32xf32>
    %136 = arith.mulf %133, %112 : vector<8x32xf32>
    %137 = arith.mulf %132, %134 : vector<8x32xf32>
    %138 = arith.addf %136, %137 : vector<8x32xf32>
    %139 = math.tanh %138 : vector<8x32xf32>
    %140 = arith.mulf %135, %139 : vector<8x32xf32>
    %141 = arith.index_cast %c4_i32 : i32 to index
    %c0_47 = arith.constant 0 : index
    %c0_48 = arith.constant 0 : index
    %142 = vector.load %arg9[%141, %c0_47, %c0_48] : memref<8x8x32xf32, #tpu.memory_space<vmem>>, vector<1x8x32xf32>
    %143 = vector.shape_cast %142 : vector<1x8x32xf32> to vector<8x32xf32>
    %144 = vector.shape_cast %140 : vector<8x32xf32> to vector<1x8x32xf32>
    tpu.vector_store %arg9[%141, %c0_47, %c0_48], %144 {strides = array<i32>} : memref<8x8x32xf32, #tpu.memory_space<vmem>>, vector<1x8x32xf32>,
    %c5_i32 = arith.constant 5 : i32
    %145 = arith.index_cast %c5_i32 : i32 to index
    %c0_49 = arith.constant 0 : index
    %c0_50 = arith.constant 0 : index
    %146 = vector.load %arg8[%145, %c0_49, %c0_50] : memref<8x8x128xf32, #tpu.memory_space<vmem>>, vector<1x8x128xf32>
    %147 = vector.shape_cast %146 : vector<1x8x128xf32> to vector<8x128xf32>
    %c0_51 = arith.constant 0 : index
    %c0_52 = arith.constant 0 : index
    %148 = vector.load %arg2[%c0_51, %c0_52] : memref<32x128xf32, #tpu.memory_space<vmem>>, vector<32x128xf32>
    %cst_53 = arith.constant dense<0.000000e+00> : vector<8x128xf32>
    %149 = tpu.matmul %140, %148, %cst_53 {dimension_numbers = #tpu.dot_dimension_numbers<[1], [0], [0], [1], [0, 0, 1, 1], [], []>} : vector<8x32xf32>, vector<32x128xf32>, vector<8x128xf32> -> vector<8x128xf32>
    %150 = arith.addf %147, %149 : vector<8x128xf32>
    %151 = math.tanh %150 : vector<8x128xf32>
    %152 = arith.negf %150 : vector<8x128xf32>
    %153 = math.exp %152 : vector<8x128xf32>
    %cst_54 = arith.constant 1.000000e+00 : f32
    %154 = vector.broadcast %cst_54 : f32 to vector<8x128xf32>
    %155 = arith.addf %154, %153 : vector<8x128xf32>
    %156 = arith.divf %154, %155 : vector<8x128xf32>
    %157 = arith.select %5, %151, %156 : vector<8x128xi1>, vector<8x128xf32>
    %158 = vector.extract_strided_slice %157 {offsets = [0, 0], sizes = [8, 32], strides = [1, 1]} : vector<8x128xf32> to vector<8x32xf32>
    %159 = vector.extract_strided_slice %157 {offsets = [0, 32], sizes = [8, 32], strides = [1, 1]} : vector<8x128xf32> to vector<8x32xf32>
    %160 = vector.extract_strided_slice %157 {offsets = [0, 64], sizes = [8, 32], strides = [1, 1]} : vector<8x128xf32> to vector<8x32xf32>
    %161 = vector.extract_strided_slice %157 {offsets = [0, 96], sizes = [8, 32], strides = [1, 1]} : vector<8x128xf32> to vector<8x32xf32>
    %162 = arith.mulf %159, %138 : vector<8x32xf32>
    %163 = arith.mulf %158, %160 : vector<8x32xf32>
    %164 = arith.addf %162, %163 : vector<8x32xf32>
    %165 = math.tanh %164 : vector<8x32xf32>
    %166 = arith.mulf %161, %165 : vector<8x32xf32>
    %167 = arith.index_cast %c5_i32 : i32 to index
    %c0_55 = arith.constant 0 : index
    %c0_56 = arith.constant 0 : index
    %168 = vector.load %arg9[%167, %c0_55, %c0_56] : memref<8x8x32xf32, #tpu.memory_space<vmem>>, vector<1x8x32xf32>
    %169 = vector.shape_cast %168 : vector<1x8x32xf32> to vector<8x32xf32>
    %170 = vector.shape_cast %166 : vector<8x32xf32> to vector<1x8x32xf32>
    tpu.vector_store %arg9[%167, %c0_55, %c0_56], %170 {strides = array<i32>} : memref<8x8x32xf32, #tpu.memory_space<vmem>>, vector<1x8x32xf32>,
    %c6_i32 = arith.constant 6 : i32
    %171 = arith.index_cast %c6_i32 : i32 to index
    %c0_57 = arith.constant 0 : index
    %c0_58 = arith.constant 0 : index
    %172 = vector.load %arg8[%171, %c0_57, %c0_58] : memref<8x8x128xf32, #tpu.memory_space<vmem>>, vector<1x8x128xf32>
    %173 = vector.shape_cast %172 : vector<1x8x128xf32> to vector<8x128xf32>
    %c0_59 = arith.constant 0 : index
    %c0_60 = arith.constant 0 : index
    %174 = vector.load %arg2[%c0_59, %c0_60] : memref<32x128xf32, #tpu.memory_space<vmem>>, vector<32x128xf32>
    %cst_61 = arith.constant dense<0.000000e+00> : vector<8x128xf32>
    %175 = tpu.matmul %166, %174, %cst_61 {dimension_numbers = #tpu.dot_dimension_numbers<[1], [0], [0], [1], [0, 0, 1, 1], [], []>} : vector<8x32xf32>, vector<32x128xf32>, vector<8x128xf32> -> vector<8x128xf32>
    %176 = arith.addf %173, %175 : vector<8x128xf32>
    %177 = math.tanh %176 : vector<8x128xf32>
    %178 = arith.negf %176 : vector<8x128xf32>
    %179 = math.exp %178 : vector<8x128xf32>
    %cst_62 = arith.constant 1.000000e+00 : f32
    %180 = vector.broadcast %cst_62 : f32 to vector<8x128xf32>
    %181 = arith.addf %180, %179 : vector<8x128xf32>
    %182 = arith.divf %180, %181 : vector<8x128xf32>
    %183 = arith.select %5, %177, %182 : vector<8x128xi1>, vector<8x128xf32>
    %184 = vector.extract_strided_slice %183 {offsets = [0, 0], sizes = [8, 32], strides = [1, 1]} : vector<8x128xf32> to vector<8x32xf32>
    %185 = vector.extract_strided_slice %183 {offsets = [0, 32], sizes = [8, 32], strides = [1, 1]} : vector<8x128xf32> to vector<8x32xf32>
    %186 = vector.extract_strided_slice %183 {offsets = [0, 64], sizes = [8, 32], strides = [1, 1]} : vector<8x128xf32> to vector<8x32xf32>
    %187 = vector.extract_strided_slice %183 {offsets = [0, 96], sizes = [8, 32], strides = [1, 1]} : vector<8x128xf32> to vector<8x32xf32>
    %188 = arith.mulf %185, %164 : vector<8x32xf32>
    %189 = arith.mulf %184, %186 : vector<8x32xf32>
    %190 = arith.addf %188, %189 : vector<8x32xf32>
    %191 = math.tanh %190 : vector<8x32xf32>
    %192 = arith.mulf %187, %191 : vector<8x32xf32>
    %193 = arith.index_cast %c6_i32 : i32 to index
    %c0_63 = arith.constant 0 : index
    %c0_64 = arith.constant 0 : index
    %194 = vector.load %arg9[%193, %c0_63, %c0_64] : memref<8x8x32xf32, #tpu.memory_space<vmem>>, vector<1x8x32xf32>
    %195 = vector.shape_cast %194 : vector<1x8x32xf32> to vector<8x32xf32>
    %196 = vector.shape_cast %192 : vector<8x32xf32> to vector<1x8x32xf32>
    tpu.vector_store %arg9[%193, %c0_63, %c0_64], %196 {strides = array<i32>} : memref<8x8x32xf32, #tpu.memory_space<vmem>>, vector<1x8x32xf32>,
    %c7_i32 = arith.constant 7 : i32
    %197 = arith.index_cast %c7_i32 : i32 to index
    %c0_65 = arith.constant 0 : index
    %c0_66 = arith.constant 0 : index
    %198 = vector.load %arg8[%197, %c0_65, %c0_66] : memref<8x8x128xf32, #tpu.memory_space<vmem>>, vector<1x8x128xf32>
    %199 = vector.shape_cast %198 : vector<1x8x128xf32> to vector<8x128xf32>
    %c0_67 = arith.constant 0 : index
    %c0_68 = arith.constant 0 : index
    %200 = vector.load %arg2[%c0_67, %c0_68] : memref<32x128xf32, #tpu.memory_space<vmem>>, vector<32x128xf32>
    %cst_69 = arith.constant dense<0.000000e+00> : vector<8x128xf32>
    %201 = tpu.matmul %192, %200, %cst_69 {dimension_numbers = #tpu.dot_dimension_numbers<[1], [0], [0], [1], [0, 0, 1, 1], [], []>} : vector<8x32xf32>, vector<32x128xf32>, vector<8x128xf32> -> vector<8x128xf32>
    %202 = arith.addf %199, %201 : vector<8x128xf32>
    %203 = math.tanh %202 : vector<8x128xf32>
    %204 = arith.negf %202 : vector<8x128xf32>
    %205 = math.exp %204 : vector<8x128xf32>
    %cst_70 = arith.constant 1.000000e+00 : f32
    %206 = vector.broadcast %cst_70 : f32 to vector<8x128xf32>
    %207 = arith.addf %206, %205 : vector<8x128xf32>
    %208 = arith.divf %206, %207 : vector<8x128xf32>
    %209 = arith.select %5, %203, %208 : vector<8x128xi1>, vector<8x128xf32>
    %210 = vector.extract_strided_slice %209 {offsets = [0, 0], sizes = [8, 32], strides = [1, 1]} : vector<8x128xf32> to vector<8x32xf32>
    %211 = vector.extract_strided_slice %209 {offsets = [0, 32], sizes = [8, 32], strides = [1, 1]} : vector<8x128xf32> to vector<8x32xf32>
    %212 = vector.extract_strided_slice %209 {offsets = [0, 64], sizes = [8, 32], strides = [1, 1]} : vector<8x128xf32> to vector<8x32xf32>
    %213 = vector.extract_strided_slice %209 {offsets = [0, 96], sizes = [8, 32], strides = [1, 1]} : vector<8x128xf32> to vector<8x32xf32>
    %214 = arith.mulf %211, %190 : vector<8x32xf32>
    %215 = arith.mulf %210, %212 : vector<8x32xf32>
    %216 = arith.addf %214, %215 : vector<8x32xf32>
    %217 = math.tanh %216 : vector<8x32xf32>
    %218 = arith.mulf %213, %217 : vector<8x32xf32>
    %219 = arith.index_cast %c7_i32 : i32 to index
    %c0_71 = arith.constant 0 : index
    %c0_72 = arith.constant 0 : index
    %220 = vector.load %arg9[%219, %c0_71, %c0_72] : memref<8x8x32xf32, #tpu.memory_space<vmem>>, vector<1x8x32xf32>
    %221 = vector.shape_cast %220 : vector<1x8x32xf32> to vector<8x32xf32>
    %222 = vector.shape_cast %218 : vector<8x32xf32> to vector<1x8x32xf32>
    tpu.vector_store %arg9[%219, %c0_71, %c0_72], %222 {strides = array<i32>} : memref<8x8x32xf32, #tpu.memory_space<vmem>>, vector<1x8x32xf32>,
    %c8_i32 = arith.constant 8 : i32
    %c0_73 = arith.constant 0 : index
    %c0_74 = arith.constant 0 : index
    %c0_75 = arith.constant 0 : index
    %223 = vector.load %arg9[%c0_73, %c0_74, %c0_75] : memref<8x8x32xf32, #tpu.memory_space<vmem>>, vector<8x8x32xf32>
    %224 = vector.shape_cast %223 : vector<8x8x32xf32> to vector<64x32xf32>
    %c0_76 = arith.constant 0 : index
    %c0_77 = arith.constant 0 : index
    %225 = vector.load %arg4[%c0_76, %c0_77] : memref<32x128xf32, #tpu.memory_space<vmem>>, vector<32x128xf32>
    %cst_78 = arith.constant dense<0.000000e+00> : vector<64x128xf32>
    %226 = tpu.matmul %224, %225, %cst_78 {dimension_numbers = #tpu.dot_dimension_numbers<[1], [0], [0], [1], [0, 0, 1, 1], [], []>} : vector<64x32xf32>, vector<32x128xf32>, vector<64x128xf32> -> vector<64x128xf32>
    %c0_79 = arith.constant 0 : index
    %c0_80 = arith.constant 0 : index
    %227 = vector.load %arg6[%c0_79, %c0_80] : memref<1x128xf32, #tpu.memory_space<vmem>>, vector<1x128xf32>
    %228 = vector.broadcast %227 : vector<1x128xf32> to vector<64x128xf32>
    %229 = arith.addf %226, %228 : vector<64x128xf32>
    %230 = vector.shape_cast %229 : vector<64x128xf32> to vector<8x8x128xf32>
    %c0_81 = arith.constant 0 : index
    %c0_82 = arith.constant 0 : index
    %c0_83 = arith.constant 0 : index
    %231 = vector.load %arg10[%c0_81, %c0_82, %c0_83] : memref<8x8x128xf32, #tpu.memory_space<vmem>>, vector<8x8x128xf32>
    tpu.vector_store %arg10[%c0_81, %c0_82, %c0_83], %230 {strides = array<i32>} : memref<8x8x128xf32, #tpu.memory_space<vmem>>, vector<8x8x128xf32>,
    %c0_i32_84 = arith.constant 0 : i32
    %232 = arith.index_cast %c0_i32_84 : i32 to index
    %c0_85 = arith.constant 0 : index
    %c0_86 = arith.constant 0 : index
    %233 = vector.load %arg10[%232, %c0_85, %c0_86] : memref<8x8x128xf32, #tpu.memory_space<vmem>>, vector<1x8x128xf32>
    %234 = vector.shape_cast %233 : vector<1x8x128xf32> to vector<8x128xf32>
    %c0_87 = arith.constant 0 : index
    %c0_88 = arith.constant 0 : index
    %235 = vector.load %arg5[%c0_87, %c0_88] : memref<32x128xf32, #tpu.memory_space<vmem>>, vector<32x128xf32>
    %cst_89 = arith.constant dense<0.000000e+00> : vector<8x128xf32>
    %236 = tpu.matmul %6, %235, %cst_89 {dimension_numbers = #tpu.dot_dimension_numbers<[1], [0], [0], [1], [0, 0, 1, 1], [], []>} : vector<8x32xf32>, vector<32x128xf32>, vector<8x128xf32> -> vector<8x128xf32>
    %237 = arith.addf %234, %236 : vector<8x128xf32>
    %238 = math.tanh %237 : vector<8x128xf32>
    %239 = arith.negf %237 : vector<8x128xf32>
    %240 = math.exp %239 : vector<8x128xf32>
    %cst_90 = arith.constant 1.000000e+00 : f32
    %241 = vector.broadcast %cst_90 : f32 to vector<8x128xf32>
    %242 = arith.addf %241, %240 : vector<8x128xf32>
    %243 = arith.divf %241, %242 : vector<8x128xf32>
    %244 = arith.select %5, %238, %243 : vector<8x128xi1>, vector<8x128xf32>
    %245 = vector.extract_strided_slice %244 {offsets = [0, 0], sizes = [8, 32], strides = [1, 1]} : vector<8x128xf32> to vector<8x32xf32>
    %246 = vector.extract_strided_slice %244 {offsets = [0, 32], sizes = [8, 32], strides = [1, 1]} : vector<8x128xf32> to vector<8x32xf32>
    %247 = vector.extract_strided_slice %244 {offsets = [0, 64], sizes = [8, 32], strides = [1, 1]} : vector<8x128xf32> to vector<8x32xf32>
    %248 = vector.extract_strided_slice %244 {offsets = [0, 96], sizes = [8, 32], strides = [1, 1]} : vector<8x128xf32> to vector<8x32xf32>
    %249 = arith.mulf %246, %6 : vector<8x32xf32>
    %250 = arith.mulf %245, %247 : vector<8x32xf32>
    %251 = arith.addf %249, %250 : vector<8x32xf32>
    %252 = math.tanh %251 : vector<8x32xf32>
    %253 = arith.mulf %248, %252 : vector<8x32xf32>
    %c1_i32_91 = arith.constant 1 : i32
    %254 = arith.index_cast %c1_i32_91 : i32 to index
    %c0_92 = arith.constant 0 : index
    %c0_93 = arith.constant 0 : index
    %255 = vector.load %arg10[%254, %c0_92, %c0_93] : memref<8x8x128xf32, #tpu.memory_space<vmem>>, vector<1x8x128xf32>
    %256 = vector.shape_cast %255 : vector<1x8x128xf32> to vector<8x128xf32>
    %c0_94 = arith.constant 0 : index
    %c0_95 = arith.constant 0 : index
    %257 = vector.load %arg5[%c0_94, %c0_95] : memref<32x128xf32, #tpu.memory_space<vmem>>, vector<32x128xf32>
    %cst_96 = arith.constant dense<0.000000e+00> : vector<8x128xf32>
    %258 = tpu.matmul %253, %257, %cst_96 {dimension_numbers = #tpu.dot_dimension_numbers<[1], [0], [0], [1], [0, 0, 1, 1], [], []>} : vector<8x32xf32>, vector<32x128xf32>, vector<8x128xf32> -> vector<8x128xf32>
    %259 = arith.addf %256, %258 : vector<8x128xf32>
    %260 = math.tanh %259 : vector<8x128xf32>
    %261 = arith.negf %259 : vector<8x128xf32>
    %262 = math.exp %261 : vector<8x128xf32>
    %cst_97 = arith.constant 1.000000e+00 : f32
    %263 = vector.broadcast %cst_97 : f32 to vector<8x128xf32>
    %264 = arith.addf %263, %262 : vector<8x128xf32>
    %265 = arith.divf %263, %264 : vector<8x128xf32>
    %266 = arith.select %5, %260, %265 : vector<8x128xi1>, vector<8x128xf32>
    %267 = vector.extract_strided_slice %266 {offsets = [0, 0], sizes = [8, 32], strides = [1, 1]} : vector<8x128xf32> to vector<8x32xf32>
    %268 = vector.extract_strided_slice %266 {offsets = [0, 32], sizes = [8, 32], strides = [1, 1]} : vector<8x128xf32> to vector<8x32xf32>
    %269 = vector.extract_strided_slice %266 {offsets = [0, 64], sizes = [8, 32], strides = [1, 1]} : vector<8x128xf32> to vector<8x32xf32>
    %270 = vector.extract_strided_slice %266 {offsets = [0, 96], sizes = [8, 32], strides = [1, 1]} : vector<8x128xf32> to vector<8x32xf32>
    %271 = arith.mulf %268, %251 : vector<8x32xf32>
    %272 = arith.mulf %267, %269 : vector<8x32xf32>
    %273 = arith.addf %271, %272 : vector<8x32xf32>
    %274 = math.tanh %273 : vector<8x32xf32>
    %275 = arith.mulf %270, %274 : vector<8x32xf32>
    %c2_i32_98 = arith.constant 2 : i32
    %276 = arith.index_cast %c2_i32_98 : i32 to index
    %c0_99 = arith.constant 0 : index
    %c0_100 = arith.constant 0 : index
    %277 = vector.load %arg10[%276, %c0_99, %c0_100] : memref<8x8x128xf32, #tpu.memory_space<vmem>>, vector<1x8x128xf32>
    %278 = vector.shape_cast %277 : vector<1x8x128xf32> to vector<8x128xf32>
    %c0_101 = arith.constant 0 : index
    %c0_102 = arith.constant 0 : index
    %279 = vector.load %arg5[%c0_101, %c0_102] : memref<32x128xf32, #tpu.memory_space<vmem>>, vector<32x128xf32>
    %cst_103 = arith.constant dense<0.000000e+00> : vector<8x128xf32>
    %280 = tpu.matmul %275, %279, %cst_103 {dimension_numbers = #tpu.dot_dimension_numbers<[1], [0], [0], [1], [0, 0, 1, 1], [], []>} : vector<8x32xf32>, vector<32x128xf32>, vector<8x128xf32> -> vector<8x128xf32>
    %281 = arith.addf %278, %280 : vector<8x128xf32>
    %282 = math.tanh %281 : vector<8x128xf32>
    %283 = arith.negf %281 : vector<8x128xf32>
    %284 = math.exp %283 : vector<8x128xf32>
    %cst_104 = arith.constant 1.000000e+00 : f32
    %285 = vector.broadcast %cst_104 : f32 to vector<8x128xf32>
    %286 = arith.addf %285, %284 : vector<8x128xf32>
    %287 = arith.divf %285, %286 : vector<8x128xf32>
    %288 = arith.select %5, %282, %287 : vector<8x128xi1>, vector<8x128xf32>
    %289 = vector.extract_strided_slice %288 {offsets = [0, 0], sizes = [8, 32], strides = [1, 1]} : vector<8x128xf32> to vector<8x32xf32>
    %290 = vector.extract_strided_slice %288 {offsets = [0, 32], sizes = [8, 32], strides = [1, 1]} : vector<8x128xf32> to vector<8x32xf32>
    %291 = vector.extract_strided_slice %288 {offsets = [0, 64], sizes = [8, 32], strides = [1, 1]} : vector<8x128xf32> to vector<8x32xf32>
    %292 = vector.extract_strided_slice %288 {offsets = [0, 96], sizes = [8, 32], strides = [1, 1]} : vector<8x128xf32> to vector<8x32xf32>
    %293 = arith.mulf %290, %273 : vector<8x32xf32>
    %294 = arith.mulf %289, %291 : vector<8x32xf32>
    %295 = arith.addf %293, %294 : vector<8x32xf32>
    %296 = math.tanh %295 : vector<8x32xf32>
    %297 = arith.mulf %292, %296 : vector<8x32xf32>
    %c3_i32_105 = arith.constant 3 : i32
    %298 = arith.index_cast %c3_i32_105 : i32 to index
    %c0_106 = arith.constant 0 : index
    %c0_107 = arith.constant 0 : index
    %299 = vector.load %arg10[%298, %c0_106, %c0_107] : memref<8x8x128xf32, #tpu.memory_space<vmem>>, vector<1x8x128xf32>
    %300 = vector.shape_cast %299 : vector<1x8x128xf32> to vector<8x128xf32>
    %c0_108 = arith.constant 0 : index
    %c0_109 = arith.constant 0 : index
    %301 = vector.load %arg5[%c0_108, %c0_109] : memref<32x128xf32, #tpu.memory_space<vmem>>, vector<32x128xf32>
    %cst_110 = arith.constant dense<0.000000e+00> : vector<8x128xf32>
    %302 = tpu.matmul %297, %301, %cst_110 {dimension_numbers = #tpu.dot_dimension_numbers<[1], [0], [0], [1], [0, 0, 1, 1], [], []>} : vector<8x32xf32>, vector<32x128xf32>, vector<8x128xf32> -> vector<8x128xf32>
    %303 = arith.addf %300, %302 : vector<8x128xf32>
    %304 = math.tanh %303 : vector<8x128xf32>
    %305 = arith.negf %303 : vector<8x128xf32>
    %306 = math.exp %305 : vector<8x128xf32>
    %cst_111 = arith.constant 1.000000e+00 : f32
    %307 = vector.broadcast %cst_111 : f32 to vector<8x128xf32>
    %308 = arith.addf %307, %306 : vector<8x128xf32>
    %309 = arith.divf %307, %308 : vector<8x128xf32>
    %310 = arith.select %5, %304, %309 : vector<8x128xi1>, vector<8x128xf32>
    %311 = vector.extract_strided_slice %310 {offsets = [0, 0], sizes = [8, 32], strides = [1, 1]} : vector<8x128xf32> to vector<8x32xf32>
    %312 = vector.extract_strided_slice %310 {offsets = [0, 32], sizes = [8, 32], strides = [1, 1]} : vector<8x128xf32> to vector<8x32xf32>
    %313 = vector.extract_strided_slice %310 {offsets = [0, 64], sizes = [8, 32], strides = [1, 1]} : vector<8x128xf32> to vector<8x32xf32>
    %314 = vector.extract_strided_slice %310 {offsets = [0, 96], sizes = [8, 32], strides = [1, 1]} : vector<8x128xf32> to vector<8x32xf32>
    %315 = arith.mulf %312, %295 : vector<8x32xf32>
    %316 = arith.mulf %311, %313 : vector<8x32xf32>
    %317 = arith.addf %315, %316 : vector<8x32xf32>
    %318 = math.tanh %317 : vector<8x32xf32>
    %319 = arith.mulf %314, %318 : vector<8x32xf32>
    %c4_i32_112 = arith.constant 4 : i32
    %320 = arith.index_cast %c4_i32_112 : i32 to index
    %c0_113 = arith.constant 0 : index
    %c0_114 = arith.constant 0 : index
    %321 = vector.load %arg10[%320, %c0_113, %c0_114] : memref<8x8x128xf32, #tpu.memory_space<vmem>>, vector<1x8x128xf32>
    %322 = vector.shape_cast %321 : vector<1x8x128xf32> to vector<8x128xf32>
    %c0_115 = arith.constant 0 : index
    %c0_116 = arith.constant 0 : index
    %323 = vector.load %arg5[%c0_115, %c0_116] : memref<32x128xf32, #tpu.memory_space<vmem>>, vector<32x128xf32>
    %cst_117 = arith.constant dense<0.000000e+00> : vector<8x128xf32>
    %324 = tpu.matmul %319, %323, %cst_117 {dimension_numbers = #tpu.dot_dimension_numbers<[1], [0], [0], [1], [0, 0, 1, 1], [], []>} : vector<8x32xf32>, vector<32x128xf32>, vector<8x128xf32> -> vector<8x128xf32>
    %325 = arith.addf %322, %324 : vector<8x128xf32>
    %326 = math.tanh %325 : vector<8x128xf32>
    %327 = arith.negf %325 : vector<8x128xf32>
    %328 = math.exp %327 : vector<8x128xf32>
    %cst_118 = arith.constant 1.000000e+00 : f32
    %329 = vector.broadcast %cst_118 : f32 to vector<8x128xf32>
    %330 = arith.addf %329, %328 : vector<8x128xf32>
    %331 = arith.divf %329, %330 : vector<8x128xf32>
    %332 = arith.select %5, %326, %331 : vector<8x128xi1>, vector<8x128xf32>
    %333 = vector.extract_strided_slice %332 {offsets = [0, 0], sizes = [8, 32], strides = [1, 1]} : vector<8x128xf32> to vector<8x32xf32>
    %334 = vector.extract_strided_slice %332 {offsets = [0, 32], sizes = [8, 32], strides = [1, 1]} : vector<8x128xf32> to vector<8x32xf32>
    %335 = vector.extract_strided_slice %332 {offsets = [0, 64], sizes = [8, 32], strides = [1, 1]} : vector<8x128xf32> to vector<8x32xf32>
    %336 = vector.extract_strided_slice %332 {offsets = [0, 96], sizes = [8, 32], strides = [1, 1]} : vector<8x128xf32> to vector<8x32xf32>
    %337 = arith.mulf %334, %317 : vector<8x32xf32>
    %338 = arith.mulf %333, %335 : vector<8x32xf32>
    %339 = arith.addf %337, %338 : vector<8x32xf32>
    %340 = math.tanh %339 : vector<8x32xf32>
    %341 = arith.mulf %336, %340 : vector<8x32xf32>
    %c5_i32_119 = arith.constant 5 : i32
    %342 = arith.index_cast %c5_i32_119 : i32 to index
    %c0_120 = arith.constant 0 : index
    %c0_121 = arith.constant 0 : index
    %343 = vector.load %arg10[%342, %c0_120, %c0_121] : memref<8x8x128xf32, #tpu.memory_space<vmem>>, vector<1x8x128xf32>
    %344 = vector.shape_cast %343 : vector<1x8x128xf32> to vector<8x128xf32>
    %c0_122 = arith.constant 0 : index
    %c0_123 = arith.constant 0 : index
    %345 = vector.load %arg5[%c0_122, %c0_123] : memref<32x128xf32, #tpu.memory_space<vmem>>, vector<32x128xf32>
    %cst_124 = arith.constant dense<0.000000e+00> : vector<8x128xf32>
    %346 = tpu.matmul %341, %345, %cst_124 {dimension_numbers = #tpu.dot_dimension_numbers<[1], [0], [0], [1], [0, 0, 1, 1], [], []>} : vector<8x32xf32>, vector<32x128xf32>, vector<8x128xf32> -> vector<8x128xf32>
    %347 = arith.addf %344, %346 : vector<8x128xf32>
    %348 = math.tanh %347 : vector<8x128xf32>
    %349 = arith.negf %347 : vector<8x128xf32>
    %350 = math.exp %349 : vector<8x128xf32>
    %cst_125 = arith.constant 1.000000e+00 : f32
    %351 = vector.broadcast %cst_125 : f32 to vector<8x128xf32>
    %352 = arith.addf %351, %350 : vector<8x128xf32>
    %353 = arith.divf %351, %352 : vector<8x128xf32>
    %354 = arith.select %5, %348, %353 : vector<8x128xi1>, vector<8x128xf32>
    %355 = vector.extract_strided_slice %354 {offsets = [0, 0], sizes = [8, 32], strides = [1, 1]} : vector<8x128xf32> to vector<8x32xf32>
    %356 = vector.extract_strided_slice %354 {offsets = [0, 32], sizes = [8, 32], strides = [1, 1]} : vector<8x128xf32> to vector<8x32xf32>
    %357 = vector.extract_strided_slice %354 {offsets = [0, 64], sizes = [8, 32], strides = [1, 1]} : vector<8x128xf32> to vector<8x32xf32>
    %358 = vector.extract_strided_slice %354 {offsets = [0, 96], sizes = [8, 32], strides = [1, 1]} : vector<8x128xf32> to vector<8x32xf32>
    %359 = arith.mulf %356, %339 : vector<8x32xf32>
    %360 = arith.mulf %355, %357 : vector<8x32xf32>
    %361 = arith.addf %359, %360 : vector<8x32xf32>
    %362 = math.tanh %361 : vector<8x32xf32>
    %363 = arith.mulf %358, %362 : vector<8x32xf32>
    %c6_i32_126 = arith.constant 6 : i32
    %364 = arith.index_cast %c6_i32_126 : i32 to index
    %c0_127 = arith.constant 0 : index
    %c0_128 = arith.constant 0 : index
    %365 = vector.load %arg10[%364, %c0_127, %c0_128] : memref<8x8x128xf32, #tpu.memory_space<vmem>>, vector<1x8x128xf32>
    %366 = vector.shape_cast %365 : vector<1x8x128xf32> to vector<8x128xf32>
    %c0_129 = arith.constant 0 : index
    %c0_130 = arith.constant 0 : index
    %367 = vector.load %arg5[%c0_129, %c0_130] : memref<32x128xf32, #tpu.memory_space<vmem>>, vector<32x128xf32>
    %cst_131 = arith.constant dense<0.000000e+00> : vector<8x128xf32>
    %368 = tpu.matmul %363, %367, %cst_131 {dimension_numbers = #tpu.dot_dimension_numbers<[1], [0], [0], [1], [0, 0, 1, 1], [], []>} : vector<8x32xf32>, vector<32x128xf32>, vector<8x128xf32> -> vector<8x128xf32>
    %369 = arith.addf %366, %368 : vector<8x128xf32>
    %370 = math.tanh %369 : vector<8x128xf32>
    %371 = arith.negf %369 : vector<8x128xf32>
    %372 = math.exp %371 : vector<8x128xf32>
    %cst_132 = arith.constant 1.000000e+00 : f32
    %373 = vector.broadcast %cst_132 : f32 to vector<8x128xf32>
    %374 = arith.addf %373, %372 : vector<8x128xf32>
    %375 = arith.divf %373, %374 : vector<8x128xf32>
    %376 = arith.select %5, %370, %375 : vector<8x128xi1>, vector<8x128xf32>
    %377 = vector.extract_strided_slice %376 {offsets = [0, 0], sizes = [8, 32], strides = [1, 1]} : vector<8x128xf32> to vector<8x32xf32>
    %378 = vector.extract_strided_slice %376 {offsets = [0, 32], sizes = [8, 32], strides = [1, 1]} : vector<8x128xf32> to vector<8x32xf32>
    %379 = vector.extract_strided_slice %376 {offsets = [0, 64], sizes = [8, 32], strides = [1, 1]} : vector<8x128xf32> to vector<8x32xf32>
    %380 = vector.extract_strided_slice %376 {offsets = [0, 96], sizes = [8, 32], strides = [1, 1]} : vector<8x128xf32> to vector<8x32xf32>
    %381 = arith.mulf %378, %361 : vector<8x32xf32>
    %382 = arith.mulf %377, %379 : vector<8x32xf32>
    %383 = arith.addf %381, %382 : vector<8x32xf32>
    %384 = math.tanh %383 : vector<8x32xf32>
    %385 = arith.mulf %380, %384 : vector<8x32xf32>
    %c7_i32_133 = arith.constant 7 : i32
    %386 = arith.index_cast %c7_i32_133 : i32 to index
    %c0_134 = arith.constant 0 : index
    %c0_135 = arith.constant 0 : index
    %387 = vector.load %arg10[%386, %c0_134, %c0_135] : memref<8x8x128xf32, #tpu.memory_space<vmem>>, vector<1x8x128xf32>
    %388 = vector.shape_cast %387 : vector<1x8x128xf32> to vector<8x128xf32>
    %c0_136 = arith.constant 0 : index
    %c0_137 = arith.constant 0 : index
    %389 = vector.load %arg5[%c0_136, %c0_137] : memref<32x128xf32, #tpu.memory_space<vmem>>, vector<32x128xf32>
    %cst_138 = arith.constant dense<0.000000e+00> : vector<8x128xf32>
    %390 = tpu.matmul %385, %389, %cst_138 {dimension_numbers = #tpu.dot_dimension_numbers<[1], [0], [0], [1], [0, 0, 1, 1], [], []>} : vector<8x32xf32>, vector<32x128xf32>, vector<8x128xf32> -> vector<8x128xf32>
    %391 = arith.addf %388, %390 : vector<8x128xf32>
    %392 = math.tanh %391 : vector<8x128xf32>
    %393 = arith.negf %391 : vector<8x128xf32>
    %394 = math.exp %393 : vector<8x128xf32>
    %cst_139 = arith.constant 1.000000e+00 : f32
    %395 = vector.broadcast %cst_139 : f32 to vector<8x128xf32>
    %396 = arith.addf %395, %394 : vector<8x128xf32>
    %397 = arith.divf %395, %396 : vector<8x128xf32>
    %398 = arith.select %5, %392, %397 : vector<8x128xi1>, vector<8x128xf32>
    %399 = vector.extract_strided_slice %398 {offsets = [0, 0], sizes = [8, 32], strides = [1, 1]} : vector<8x128xf32> to vector<8x32xf32>
    %400 = vector.extract_strided_slice %398 {offsets = [0, 32], sizes = [8, 32], strides = [1, 1]} : vector<8x128xf32> to vector<8x32xf32>
    %401 = vector.extract_strided_slice %398 {offsets = [0, 64], sizes = [8, 32], strides = [1, 1]} : vector<8x128xf32> to vector<8x32xf32>
    %402 = vector.extract_strided_slice %398 {offsets = [0, 96], sizes = [8, 32], strides = [1, 1]} : vector<8x128xf32> to vector<8x32xf32>
    %403 = arith.mulf %400, %383 : vector<8x32xf32>
    %404 = arith.mulf %399, %401 : vector<8x32xf32>
    %405 = arith.addf %403, %404 : vector<8x32xf32>
    %406 = math.tanh %405 : vector<8x32xf32>
    %407 = arith.mulf %402, %406 : vector<8x32xf32>
    %c8_i32_140 = arith.constant 8 : i32
    %c0_141 = arith.constant 0 : index
    %c0_142 = arith.constant 0 : index
    %408 = vector.load %arg7[%c0_141, %c0_142] : memref<8x32xf32, #tpu.memory_space<vmem>>, vector<8x32xf32>
    tpu.vector_store %arg7[%c0_141, %c0_142], %407 {strides = array<i32>} : memref<8x32xf32, #tpu.memory_space<vmem>>, vector<8x32xf32>,
    return
  }
}

</mosaic_0001>

<bundles_post_ra>
// kernel: tpu_custom_call.1
= control target key start
LH: loop header
LB: loop body
LE: loop exit
PB: predicated region body
PF: predicated region fallthrough
CT: control target
= control target key end

     0   :  { %12 = vsyncpa [#allocation6], 0  ;;  %s3096_s0 = inlined_call_operand.vmem [shape: f32[64,8], index: 0, kind: input, shape index: {}]   ;;  %s3097_s1 = inlined_call_operand.vmem [shape: f32[8,128], index: 1, kind: input, shape index: {}]   ;;  %s3098_s2 = inlined_call_operand.vmem [shape: f32[32,128], index: 2, kind: input, shape index: {}]   ;;  %s3099_s3 = inlined_call_operand.vmem [shape: f32[1,128], index: 3, kind: input, shape index: {}]   ;;  %s3100_s4 = inlined_call_operand.vmem [shape: f32[32,128], index: 4, kind: input, shape index: {}]   ;;  %s3101_s5 = inlined_call_operand.hbm [shape: f32[32,128], index: 5, kind: input, shape index: {}]   ;;  %s3102_s6 = inlined_call_operand.vmem [shape: f32[1,128], index: 6, kind: input, shape index: {}]   ;;  %s3103_s7 = inlined_call_operand.hbm [shape: f32[8,32], index: 7, kind: output, shape index: {}]  }
   0x1   :  { %13 = vsyncpa [#allocation7], 0  ;;  %s2617_s24 = smov [#allocation5]  }
   0x2   :  { %s29_s25 = sshll.u32 %s2617_s24, 4  ;;  %s30_s25 = int_to_ptr.vmem [resolvable:$true] %s29_s25 }
   0x3   :  { %s2581_s26 = scalar_lea.vmem %s30_s25, 512  ;;  %p2586_p1 = scmp.lt.s32.totalorder %s30_s25, %s30_s25 }
   0x4   :  { %p2582_p0 = scmp.ne.s32.totalorder %s30_s25, %s2581_s26  ;;  %p2587_p2 = scmp.lt.s32.totalorder %s2581_s26, %s2581_s26 }
   0x6   :  { %p2588_p3 = por %p2587_p2, %p2586_p1 }
   0x8   :  { %p2589_p4 = pnand %p2588_p3, %p2582_p0 }
   0xa   :  { %2592 = shalt.err (!%p2589_p4)
}
   0xb   :  { %s2618_s27 = smov 128   ;;  %s2619_s28 = smov 8  }
   0xc   :  { %35 = dma.hbm_to_vmem [thread:$0]  %s3101_s5, 512, %s30_s25, [#allocation6], %s2618_s27, %s2618_s27, %s2619_s28  }
   0xd   :  { %2613 = dma.done.wait [#allocation6], 512  }
   0xe   :  { %2614 = vsyncadd [#allocation6], 4294966784  ;;  %v2620_v0 = vmov 0.0   ;;  %vm2621_vm0 = vmmov 0   ;;  %vm62_vm1 = vcmask 64512   ;;  %v54_v1 = vld [vmem:[%s3097_s1] sm:$0xff]  ;;  %v41_v18 = vlaneseq }
   0xf   :  { %2241 = vmatprep.subr.mxu1 %v2620_v0  ;;  %2249 = vmatprep.mubr.msk.f32.mxu1 %vm2621_vm0, %v2620_v0  ;;  %v2677_v2 = vld [vmem:[%s3098_s2 + $0x18] sm:$0xff]  ;;  %v46_v3 = vld [vmem:[%s3096_s0] sm:$0xff]  ;;  %v47_v4 = vld [vmem:[%s3096_s0 + $0x8] sm:$0xff]  ;;  %s2623_s21 = smov 32   ;;  %vm205_vm5 = vcmask 261120  }
  0x10   :  { %2227 = vmatprep.subr.mxu0 %v54_v1  ;;  %2242 = vmatpush3.msra.mxu1 %v2677_v2  ;;  %v2689_v5 = vld [vmem:[%s3098_s2 + $0x10] sm:$0xff]  ;;  %v2697_v6 = vld [vmem:[%s3098_s2 + $0x8] sm:$0xff]  ;;  %v2705_v7 = vld [vmem:[%s3098_s2] sm:$0xff]  ;;  %v42_v19 = vand.u32 127, %v41_v18 }
  0x11   :  { %2228 = vmatpush3.msra.mxu0 %v54_v1  ;;  %2229 = vmatprep.mubr.msk.f32.mxu0 %vm62_vm1, %v46_v3  ;;  %v2733_v9 = vld [vmem:[%s3099_s3] ss:$0 sm:$0xff]  ;;  %s2622_s3 = smov 64   ;;  %v48_v48 = vld [vmem:[%s3096_s0 + $0x10] sm:$0xff]  ;;  %v49_v49 = vld [vmem:[%s3096_s0 + $0x18] sm:$0xff] }
  0x12   :  { %2243 = vmatprep.subr.mxu1 %v2620_v0  ;;  %2230 = vmatmul.mubr.msk.f32.vlgmr.msra.gmra.mxu0 %vm62_vm1, %v47_v4  ;;  %vm43_vm2 = vcmp.ge.s32.totalorder %v42_v19, 64  ;;  %vm44_vm3 = vcmp.lt.s32.totalorder %v42_v19, 96  ;;  %v50_v50 = vld [vmem:[%s3096_s0 + $0x20] sm:$0xff]  ;;  %v51_v51 = vld [vmem:[%s3096_s0 + $0x28] sm:$0xff]  ;;  %v52_v52 = vld [vmem:[%s3096_s0 + $0x30] sm:$0xff] }
  0x13   :  { %2244 = vmatpush3.msra.mxu1 %v2689_v5  ;;  %2263 = vmatprep.subr.mxu0 %v2620_v0  ;;  %vm2736_vm4 = vmand %vm43_vm2, %vm44_vm3  ;;  %v53_v53 = vld [vmem:[%s3096_s0 + $0x38] sm:$0xff] }
  0x14   :  { %2245 = vmatprep.subr.mxu1 %v2620_v0  ;;  %2264 = vmatpush3.msra.mxu0 %v2677_v2 }
  0x15   :  { %2246 = vmatpush3.msra.mxu1 %v2697_v6  ;;  %2265 = vmatprep.subr.mxu0 %v2620_v0 }
  0x16   :  { %2247 = vmatprep.subr.mxu1 %v2620_v0  ;;  %2266 = vmatpush3.msra.mxu0 %v2689_v5 }
  0x17   :  { %2248 = vmatpush3.msra.mxu1 %v2705_v7  ;;  %2267 = vmatprep.subr.mxu0 %v2620_v0 }
  0x18   :  { %2250 = vmatmul.mubr.f32.vlgmr.msra.gmra.mxu1 %v2620_v0  ;;  %2252 = vmatprep.subr.mxu1 %v2620_v0 }
  0x19   :  { %2253 = vmatpush3.msra.mxu1 %v2677_v2  ;;  %2260 = vmatprep.mubr.msk.f32.mxu1 %vm2621_vm0, %v2620_v0 }
  0x1a   :  { %2254 = vmatprep.subr.mxu1 %v2620_v0  ;;  %2268 = vmatpush3.msra.mxu0 %v2697_v6 }
  0x1b   :  { %2255 = vmatpush3.msra.mxu1 %v2689_v5  ;;  %2269 = vmatprep.subr.mxu0 %v2620_v0 }
  0x1c   :  { %2256 = vmatprep.subr.mxu1 %v2620_v0  ;;  %2270 = vmatpush3.msra.mxu0 %v2705_v7 }
  0x1d   :  { %2257 = vmatpush3.msra.mxu1 %v2697_v6  ;;  %2285 = vmatprep.subr.mxu0 %v2620_v0 }
  0x1e   :  { %2258 = vmatprep.subr.mxu1 %v2620_v0  ;;  %2232 = vmatprep.mubr.msk.f32.mxu0 %vm62_vm1, %v48_v48 }
  0x1f   :  { %2259 = vmatpush3.msra.mxu1 %v2705_v7  ;;  %2233 = vmatmul.mubr.msk.f32.gmra.mxu0 %vm62_vm1, %v49_v49 }
  0x20   :  { %2274 = vmatprep.subr.mxu1 %v2620_v0  ;;  %2235 = vmatprep.mubr.msk.f32.mxu0 %vm62_vm1, %v50_v50 }
  0x23   :  { %2236 = vmatmul.mubr.msk.f32.gmra.mxu0 %vm62_vm1, %v51_v51 }
  0x24   :  { %2238 = vmatprep.mubr.msk.f32.mxu0 %vm62_vm1, %v52_v52 }
  0x27   :  { %2239 = vmatmul.mubr.msk.f32.gmra.mxu0 %vm62_vm1, %v53_v53 }
  0x28   :  { %2271 = vmatprep.mubr.msk.f32.mxu0 %vm2621_vm0, %v2620_v0 }
  0xd2   :  { %v2231_v8 = vpop.f32.mrf.mxu0 }
  0xd3   :  { %v159_v33 = vadd.f32 %v2231_v8, %v2733_v9 }
  0xd4   :  { %v153_v10 = vpop.f32.mrf.mxu0 }
  0xd5   :  { %v154_v11 = vadd.f32 %v2733_v9, %v153_v10 }
  0xd8   :  { %v275_v12 = vpop.f32.mrf.mxu1 }
  0xd9   :  { %v279_v13 = vadd.f32 %v275_v12, %v154_v11 }
  0xda   :  { %v2251_v14 = vpop.f32.mrf.mxu1 }
  0xdb   :  { %v2087_v15 = vmul.f32 -1.442695, %v279_v13 }
  0xdd   :  { %2445 = vpow2.f32 %v2087_v15 }
  0xde   :  { %2447 = vtanh.f32 %v279_v13 }
  0xdf   :  { %v2234_v58 = vpop.f32.mrf.mxu0 }
  0xe1   :  { %v163_v59 = vpop.f32.mrf.mxu0 }
  0xe2   :  { %v164_v1 = vadd.f32 %v2733_v9, %v163_v59 }
  0xe3   :  { %v2803_v60 = vpop.f32.mrf.mxu0 }
  0xe5   :  { %v2805_v61 = vpop.f32.mrf.mxu0 }
  0xe7   :  { %v2807_v62 = vpop.f32.mrf.mxu0 }
  0xe9   :  { %v2809_v63 = vpop.f32.mrf.mxu0 }
  0xea   :  { %v2446_v16 = vpop.eup %2445 }
  0xeb   :  { %v284_v17 = vadd.f32 1.0, %v2446_v16  ;;  %v2448_v21 = vpop.eup %2447 }
  0xed   :  { %2449 = vrcp.f32 %v284_v17 }
  0xfa   :  { %v2450_v22 = vpop.eup %2449 }
  0xfb   :  { %v287_v23 = vsel %vm2736_vm4, %v2448_v21, %v2450_v22 }
  0xfc   :  { %290 = vrot.lane.b32.xlu0 %v287_v23, %s2622_s3  ;;  %v288_v26 = vmul.f32 0.0, %v287_v23 }
 0x16e   :  { %v291_v24 = vpop.permute.xlu0 %290 }
 0x16f   :  { %v293_v25 = vmul.f32 %v291_v24, %v287_v23 }
 0x171   :  { %295 = vrot.lane.b32.xlu0 %v293_v25, %s2623_s21 }
 0x1e3   :  { %v296_v27 = vpop.permute.xlu0 %295 }
 0x1e4   :  { %v298_v28 = vadd.f32 %v296_v27, %v288_v26  ;;  %v169_v26 = vadd.f32 %v2234_v58, %v2733_v9 }
 0x1e6   :  { %2451 = vtanh.f32 %v298_v28 }
 0x1f3   :  { %v2452_v29 = vpop.eup %2451 }
 0x1f4   :  { %301 = vrot.lane.b32.xlu1 %v2452_v29, %s2622_s3 }
 0x266   :  { %v302_v30 = vpop.permute.xlu1 %301 }
 0x267   :  { %v304_v31 = vmul.f32 %v302_v30, %v287_v23 }
 0x269   :  { %306 = vrot.lane.b32.xlu1 %v304_v31, %s2623_s21 }
 0x2db   :  { %v307_v32 = vpop.permute.xlu1 %306 }
 0x2dc   :  { %309 = vst.msk [vmem:[#allocation3] sm:$0xff] %vm205_vm5, %v307_v32  ;;  %2261 = vmatmul.mubr.msk.f32.vlgmr.msra.gmra.mxu1 %vm205_vm5, %v307_v32 }
 0x2dd   :  { %2275 = vmatpush3.msra.mxu1 %v2677_v2  ;;  %2282 = vmatprep.mubr.msk.f32.mxu1 %vm2621_vm0, %v2620_v0 }
 0x2de   :  { %2276 = vmatprep.subr.mxu1 %v2620_v0 }
 0x2df   :  { %2277 = vmatpush3.msra.mxu1 %v2689_v5 }
 0x2e0   :  { %2278 = vmatprep.subr.mxu1 %v2620_v0 }
 0x2e1   :  { %2279 = vmatpush3.msra.mxu1 %v2697_v6 }
 0x2e2   :  { %2280 = vmatprep.subr.mxu1 %v2620_v0 }
 0x2e3   :  { %2281 = vmatpush3.msra.mxu1 %v2705_v7 }
 0x2e4   :  { %2296 = vmatprep.subr.mxu1 %v2620_v0 }
 0x39c   :  { %v384_v34 = vpop.f32.mrf.mxu1 }
 0x39d   :  { %v388_v35 = vadd.f32 %v384_v34, %v159_v33 }
 0x39e   :  { %v2262_v36 = vpop.f32.mrf.mxu1 }
 0x39f   :  { %v2089_v37 = vmul.f32 -1.442695, %v388_v35 }
 0x3a1   :  { %2453 = vpow2.f32 %v2089_v37 }
 0x3a2   :  { %2455 = vtanh.f32 %v388_v35 }
 0x3ae   :  { %v2454_v38 = vpop.eup %2453 }
 0x3af   :  { %v393_v39 = vadd.f32 1.0, %v2454_v38  ;;  %v2456_v40 = vpop.eup %2455 }
 0x3b1   :  { %2457 = vrcp.f32 %v393_v39 }
 0x3be   :  { %v2458_v41 = vpop.eup %2457 }
 0x3bf   :  { %v396_v42 = vsel %vm2736_vm4, %v2456_v40, %v2458_v41 }
 0x3c0   :  { %399 = vrot.lane.b32.xlu0 %v396_v42, %s2622_s3  ;;  %v397_v45 = vmul.f32 %v396_v42, %v298_v28 }
 0x432   :  { %v400_v43 = vpop.permute.xlu0 %399 }
 0x433   :  { %v402_v44 = vmul.f32 %v400_v43, %v396_v42 }
 0x435   :  { %404 = vrot.lane.b32.xlu1 %v402_v44, %s2623_s21 }
 0x4a7   :  { %v405_v46 = vpop.permute.xlu1 %404 }
 0x4a8   :  { %v407_v47 = vadd.f32 %v405_v46, %v397_v45  ;;  %v174_v45 = vadd.f32 %v2733_v9, %v2805_v61 }
 0x4aa   :  { %2459 = vtanh.f32 %v407_v47 }
 0x4b7   :  { %v2460_v54 = vpop.eup %2459 }
 0x4b8   :  { %410 = vrot.lane.b32.xlu0 %v2460_v54, %s2622_s3 }
 0x52a   :  { %v411_v55 = vpop.permute.xlu0 %410 }
 0x52b   :  { %v413_v56 = vmul.f32 %v411_v55, %v396_v42 }
 0x52d   :  { %415 = vrot.lane.b32.xlu1 %v413_v56, %s2623_s21 }
 0x59f   :  { %v416_v57 = vpop.permute.xlu1 %415 }
 0x5a0   :  { %419 = vst.msk [vmem:[#allocation3 + $0x8] sm:$0xff] %vm205_vm5, %v416_v57  ;;  %2272 = vmatmul.mubr.msk.f32.vlgmr.msra.gmra.mxu0 %vm205_vm5, %v416_v57 }
 0x5a1   :  { %2286 = vmatpush3.msra.mxu0 %v2677_v2  ;;  %2293 = vmatprep.mubr.msk.f32.mxu0 %vm2621_vm0, %v2620_v0 }
 0x5a2   :  { %2287 = vmatprep.subr.mxu0 %v2620_v0 }
 0x5a3   :  { %2288 = vmatpush3.msra.mxu0 %v2689_v5 }
 0x5a4   :  { %2289 = vmatprep.subr.mxu0 %v2620_v0 }
 0x5a5   :  { %2290 = vmatpush3.msra.mxu0 %v2697_v6 }
 0x5a6   :  { %2291 = vmatprep.subr.mxu0 %v2620_v0 }
 0x5a7   :  { %2292 = vmatpush3.msra.mxu0 %v2705_v7 }
 0x5a8   :  { %2307 = vmatprep.subr.mxu0 %v2620_v0 }
 0x660   :  { %v494_v3 = vpop.f32.mrf.mxu0 }
 0x661   :  { %v498_v4 = vadd.f32 %v494_v3, %v164_v1 }
 0x662   :  { %v2273_v8 = vpop.f32.mrf.mxu0 }
 0x663   :  { %v2091_v10 = vmul.f32 -1.442695, %v498_v4 }
 0x665   :  { %2461 = vpow2.f32 %v2091_v10 }
 0x666   :  { %2463 = vtanh.f32 %v498_v4 }
 0x672   :  { %v2462_v11 = vpop.eup %2461 }
 0x673   :  { %v503_v12 = vadd.f32 1.0, %v2462_v11  ;;  %v2464_v13 = vpop.eup %2463 }
 0x675   :  { %2465 = vrcp.f32 %v503_v12 }
 0x682   :  { %v2466_v14 = vpop.eup %2465 }
 0x683   :  { %v506_v15 = vsel %vm2736_vm4, %v2464_v13, %v2466_v14 }
 0x684   :  { %509 = vrot.lane.b32.xlu0 %v506_v15, %s2622_s3  ;;  %v507_v18 = vmul.f32 %v506_v15, %v407_v47 }
 0x6f6   :  { %v510_v16 = vpop.permute.xlu0 %509 }
 0x6f7   :  { %v512_v17 = vmul.f32 %v510_v16, %v506_v15 }
 0x6f9   :  { %514 = vrot.lane.b32.xlu1 %v512_v17, %s2623_s21 }
 0x76b   :  { %v515_v19 = vpop.permute.xlu1 %514 }
 0x76c   :  { %v517_v21 = vadd.f32 %v515_v19, %v507_v18  ;;  %v1091_v19 = vld [vmem:[%s3100_s4 + $0x18] sm:$0xff] }
 0x76e   :  { %2467 = vtanh.f32 %v517_v21 }
 0x77b   :  { %v2468_v22 = vpop.eup %2467 }
 0x77c   :  { %520 = vrot.lane.b32.xlu0 %v2468_v22, %s2622_s3 }
 0x7ee   :  { %v521_v23 = vpop.permute.xlu0 %520 }
 0x7ef   :  { %v523_v24 = vmul.f32 %v521_v23, %v506_v15 }
 0x7f1   :  { %525 = vrot.lane.b32.xlu1 %v523_v24, %s2623_s21 }
 0x863   :  { %v526_v25 = vpop.permute.xlu1 %525 }
 0x864   :  { %529 = vst.msk [vmem:[#allocation3 + $0x10] sm:$0xff] %vm205_vm5, %v526_v25  ;;  %2283 = vmatmul.mubr.msk.f32.vlgmr.msra.gmra.mxu1 %vm205_vm5, %v526_v25  ;;  %v1090_v25 = vld [vmem:[%s3100_s4 + $0x10] sm:$0xff] }
 0x865   :  { %2297 = vmatpush3.msra.mxu1 %v2677_v2  ;;  %2304 = vmatprep.mubr.msk.f32.mxu1 %vm2621_vm0, %v2620_v0 }
 0x866   :  { %2298 = vmatprep.subr.mxu1 %v2620_v0 }
 0x867   :  { %2299 = vmatpush3.msra.mxu1 %v2689_v5 }
 0x868   :  { %2300 = vmatprep.subr.mxu1 %v2620_v0 }
 0x869   :  { %2301 = vmatpush3.msra.mxu1 %v2697_v6 }
 0x86a   :  { %2302 = vmatprep.subr.mxu1 %v2620_v0 }
 0x86b   :  { %2303 = vmatpush3.msra.mxu1 %v2705_v7 }
 0x86c   :  { %2318 = vmatprep.subr.mxu1 %v2620_v0 }
 0x924   :  { %v604_v27 = vpop.f32.mrf.mxu1 }
 0x925   :  { %v608_v28 = vadd.f32 %v604_v27, %v169_v26  ;;  %v1080_v26 = vld [vmem:[#allocation3] sm:$0xff]  ;;  %v1089_v27 = vld [vmem:[%s3100_s4 + $0x8] sm:$0xff] }
 0x926   :  { %v2284_v29 = vpop.f32.mrf.mxu1 }
 0x927   :  { %v2093_v30 = vmul.f32 -1.442695, %v608_v28  ;;  %v1081_v29 = vld [vmem:[#allocation3 + $0x8] sm:$0xff] }
 0x929   :  { %2469 = vpow2.f32 %v2093_v30  ;;  %v1082_v30 = vld [vmem:[#allocation3 + $0x10] sm:$0xff] }
 0x92a   :  { %2471 = vtanh.f32 %v608_v28  ;;  %v1088_v28 = vld [vmem:[%s3100_s4] sm:$0xff] }
 0x936   :  { %v2470_v31 = vpop.eup %2469 }
 0x937   :  { %v613_v32 = vadd.f32 1.0, %v2470_v31  ;;  %v2472_v33 = vpop.eup %2471 }
 0x939   :  { %2473 = vrcp.f32 %v613_v32 }
 0x946   :  { %v2474_v34 = vpop.eup %2473 }
 0x947   :  { %v616_v35 = vsel %vm2736_vm4, %v2472_v33, %v2474_v34  ;;  %v184_v34 = vadd.f32 %v2733_v9, %v2809_v63 }
 0x948   :  { %619 = vrot.lane.b32.xlu0 %v616_v35, %s2622_s3  ;;  %v617_v38 = vmul.f32 %v616_v35, %v517_v21 }
 0x9ba   :  { %v620_v36 = vpop.permute.xlu0 %619 }
 0x9bb   :  { %v622_v37 = vmul.f32 %v620_v36, %v616_v35 }
 0x9bd   :  { %624 = vrot.lane.b32.xlu1 %v622_v37, %s2623_s21 }
 0xa2f   :  { %v625_v39 = vpop.permute.xlu1 %624 }
 0xa30   :  { %v627_v40 = vadd.f32 %v625_v39, %v617_v38 }
 0xa32   :  { %2475 = vtanh.f32 %v627_v40 }
 0xa3f   :  { %v2476_v41 = vpop.eup %2475 }
 0xa40   :  { %630 = vrot.lane.b32.xlu0 %v2476_v41, %s2622_s3 }
 0xab2   :  { %v631_v42 = vpop.permute.xlu0 %630 }
 0xab3   :  { %v633_v43 = vmul.f32 %v631_v42, %v616_v35 }
 0xab5   :  { %635 = vrot.lane.b32.xlu1 %v633_v43, %s2623_s21 }
 0xb27   :  { %v636_v44 = vpop.permute.xlu1 %635 }
 0xb28   :  { %639 = vst.msk [vmem:[#allocation3 + $0x18] sm:$0xff] %vm205_vm5, %v636_v44  ;;  %2294 = vmatmul.mubr.msk.f32.vlgmr.msra.gmra.mxu0 %vm205_vm5, %v636_v44 }
 0xb29   :  { %2308 = vmatpush3.msra.mxu0 %v2677_v2  ;;  %2315 = vmatprep.mubr.msk.f32.mxu0 %vm2621_vm0, %v2620_v0 }
 0xb2a   :  { %2309 = vmatprep.subr.mxu0 %v2620_v0 }
 0xb2b   :  { %2310 = vmatpush3.msra.mxu0 %v2689_v5 }
 0xb2c   :  { %2311 = vmatprep.subr.mxu0 %v2620_v0 }
 0xb2d   :  { %2312 = vmatpush3.msra.mxu0 %v2697_v6 }
 0xb2e   :  { %2313 = vmatprep.subr.mxu0 %v2620_v0 }
 0xb2f   :  { %2314 = vmatpush3.msra.mxu0 %v2705_v7  ;;  %v1083_v31 = vld [vmem:[#allocation3 + $0x18] sm:$0xff] }
 0xb30   :  { %2329 = vmatprep.subr.mxu0 %v1091_v19 }
 0xbe8   :  { %v714_v46 = vpop.f32.mrf.mxu0 }
 0xbe9   :  { %v718_v47 = vadd.f32 %v714_v46, %v174_v45 }
 0xbea   :  { %v2295_v48 = vpop.f32.mrf.mxu0 }
 0xbeb   :  { %v2095_v49 = vmul.f32 -1.442695, %v718_v47 }
 0xbed   :  { %2477 = vpow2.f32 %v2095_v49  ;;  %v2907_v49 = vld [vmem:[#allocation5 + $0x18] sm:$0xff] }
 0xbee   :  { %2479 = vtanh.f32 %v718_v47 }
 0xbfa   :  { %v2478_v50 = vpop.eup %2477 }
 0xbfb   :  { %v723_v51 = vadd.f32 1.0, %v2478_v50  ;;  %v2480_v52 = vpop.eup %2479  ;;  %v2910_v50 = vld [vmem:[#allocation5 + $0x10] sm:$0xff] }
 0xbfd   :  { %2481 = vrcp.f32 %v723_v51  ;;  %v2914_v51 = vld [vmem:[#allocation5 + $0x8] sm:$0xff] }
 0xc0a   :  { %v2482_v53 = vpop.eup %2481 }
 0xc0b   :  { %v726_v54 = vsel %vm2736_vm4, %v2480_v52, %v2482_v53  ;;  %v2918_v52 = vld [vmem:[#allocation5] sm:$0xff] }
 0xc0c   :  { %729 = vrot.lane.b32.xlu0 %v726_v54, %s2622_s3  ;;  %v727_v57 = vmul.f32 %v726_v54, %v627_v40 }
 0xc7e   :  { %v730_v55 = vpop.permute.xlu0 %729 }
 0xc7f   :  { %v732_v56 = vmul.f32 %v730_v55, %v726_v54 }
 0xc81   :  { %734 = vrot.lane.b32.xlu1 %v732_v56, %s2623_s21 }
 0xcf3   :  { %v735_v58 = vpop.permute.xlu1 %734 }
 0xcf4   :  { %v737_v59 = vadd.f32 %v735_v58, %v727_v57  ;;  %v189_v57 = vadd.f32 %v2807_v62, %v2733_v9 }
 0xcf6   :  { %2483 = vtanh.f32 %v737_v59 }
 0xd03   :  { %v2484_v61 = vpop.eup %2483 }
 0xd04   :  { %740 = vrot.lane.b32.xlu0 %v2484_v61, %s2622_s3 }
 0xd76   :  { %v741_v1 = vpop.permute.xlu0 %740 }
 0xd77   :  { %v743_v3 = vmul.f32 %v741_v1, %v726_v54 }
 0xd79   :  { %745 = vrot.lane.b32.xlu1 %v743_v3, %s2623_s21 }
 0xdeb   :  { %v746_v4 = vpop.permute.xlu1 %745 }
 0xdec   :  { %749 = vst.msk [vmem:[#allocation3 + $0x20] sm:$0xff] %vm205_vm5, %v746_v4  ;;  %2305 = vmatmul.mubr.msk.f32.vlgmr.msra.gmra.mxu1 %vm205_vm5, %v746_v4  ;;  %v2955_v4 = vld [vmem:[%s3102_s6] ss:$0 sm:$0xff]  ;;  %s2624_s6 = smov [#allocation8]  }
 0xded   :  { %2319 = vmatpush3.msra.mxu1 %v2677_v2  ;;  %2326 = vmatprep.mubr.msk.f32.mxu1 %vm2621_vm0, %v2620_v0  ;;  %v179_v2 = vadd.f32 %v2803_v60, %v2733_v9  ;;  %s2069_s17 = sshll.u32 %s2624_s6, 4  ;;  %s2070_s17 = int_to_ptr.vmem [resolvable:$true] %s2069_s17 }
 0xdee   :  { %2320 = vmatprep.subr.mxu1 %v2620_v0  ;;  %s2593_s18 = scalar_lea.vmem %s2070_s17, 128  ;;  %p2598_p6 = scmp.lt.s32.totalorder %s2070_s17, %s2070_s17 }
 0xdef   :  { %2321 = vmatpush3.msra.mxu1 %v2689_v5  ;;  %p2594_p5 = scmp.ne.s32.totalorder %s2070_s17, %s2593_s18  ;;  %p2599_p7 = scmp.lt.s32.totalorder %s2593_s18, %s2593_s18 }
 0xdf0   :  { %2322 = vmatprep.subr.mxu1 %v2620_v0 }
 0xdf1   :  { %2323 = vmatpush3.msra.mxu1 %v2697_v6  ;;  %p2600_p8 = por %p2599_p7, %p2598_p6 }
 0xdf2   :  { %2324 = vmatprep.subr.mxu1 %v2620_v0 }
 0xdf3   :  { %2325 = vmatpush3.msra.mxu1 %v2705_v7  ;;  %v1084_v32 = vld [vmem:[#allocation3 + $0x20] sm:$0xff]  ;;  %p2601_p9 = pnand %p2600_p8, %p2594_p5 }
 0xdf4   :  { %2349 = vmatprep.subr.mxu1 %v2620_v0 }
 0xeac   :  { %v824_v8 = vpop.f32.mrf.mxu1 }
 0xead   :  { %v828_v10 = vadd.f32 %v824_v8, %v179_v2 }
 0xeae   :  { %v2306_v11 = vpop.f32.mrf.mxu1 }
 0xeaf   :  { %v2097_v12 = vmul.f32 -1.442695, %v828_v10 }
 0xeb1   :  { %2485 = vpow2.f32 %v2097_v12 }
 0xeb2   :  { %2487 = vtanh.f32 %v828_v10 }
 0xebe   :  { %v2486_v13 = vpop.eup %2485 }
 0xebf   :  { %v833_v5 = vadd.f32 1.0, %v2486_v13  ;;  %v2488_v14 = vpop.eup %2487 }
 0xec1   :  { %2489 = vrcp.f32 %v833_v5 }
 0xece   :  { %v2490_v6 = vpop.eup %2489 }
 0xecf   :  { %v836_v15 = vsel %vm2736_vm4, %v2488_v14, %v2490_v6 }
 0xed0   :  { %839 = vrot.lane.b32.xlu0 %v836_v15, %s2622_s3  ;;  %v837_v60 = vmul.f32 %v836_v15, %v737_v59 }
 0xf42   :  { %v840_v7 = vpop.permute.xlu0 %839 }
 0xf43   :  { %v842_v16 = vmul.f32 %v840_v7, %v836_v15 }
 0xf45   :  { %844 = vrot.lane.b32.xlu1 %v842_v16, %s2623_s21 }
 0xfb7   :  { %v845_v17 = vpop.permute.xlu1 %844 }
 0xfb8   :  { %v847_v18 = vadd.f32 %v845_v17, %v837_v60 }
 0xfba   :  { %2491 = vtanh.f32 %v847_v18 }
 0xfc7   :  { %v2492_v21 = vpop.eup %2491 }
 0xfc8   :  { %850 = vrot.lane.b32.xlu0 %v2492_v21, %s2622_s3 }
0x103a   :  { %v851_v22 = vpop.permute.xlu0 %850 }
0x103b   :  { %v853_v23 = vmul.f32 %v851_v22, %v836_v15 }
0x103d   :  { %855 = vrot.lane.b32.xlu1 %v853_v23, %s2623_s21 }
0x10af   :  { %v856_v24 = vpop.permute.xlu1 %855 }
0x10b0   :  { %859 = vst.msk [vmem:[#allocation3 + $0x28] sm:$0xff] %vm205_vm5, %v856_v24  ;;  %2316 = vmatmul.mubr.msk.f32.vlgmr.msra.gmra.mxu0 %vm205_vm5, %v856_v24 }
0x10b1   :  { %2330 = vmatpush3.msra.mxu0 %v1091_v19  ;;  %2337 = vmatprep.mubr.msk.f32.mxu0 %vm205_vm5, %v1080_v26 }
0x10b2   :  { %2331 = vmatprep.subr.mxu0 %v1090_v25 }
0x10b3   :  { %2332 = vmatpush3.msra.mxu0 %v1090_v25 }
0x10b4   :  { %2333 = vmatprep.subr.mxu0 %v1089_v27 }
0x10b5   :  { %2334 = vmatpush3.msra.mxu0 %v1089_v27 }
0x10b6   :  { %2335 = vmatprep.subr.mxu0 %v1088_v28 }
0x10b7   :  { %2336 = vmatpush3.msra.mxu0 %v1088_v28  ;;  %v1085_v33 = vld [vmem:[#allocation3 + $0x28] sm:$0xff] }
0x10b8   :  { %2338 = vmatmul.mubr.msk.f32.vlgmr.msra.gmra.mxu0 %vm205_vm5, %v1081_v29  ;;  %2371 = vmatprep.subr.mxu0 %v2620_v0 }
0x10b9   :  { %2340 = vmatprep.mubr.msk.f32.mxu0 %vm205_vm5, %v1082_v30  ;;  %2372 = vmatpush3.msra.mxu0 %v2907_v49 }
0x10ba   :  { %2373 = vmatprep.subr.mxu0 %v2620_v0 }
0x10bb   :  { %2374 = vmatpush3.msra.mxu0 %v2910_v50 }
0x10bc   :  { %2341 = vmatmul.mubr.msk.f32.gmra.mxu0 %vm205_vm5, %v1083_v31  ;;  %2375 = vmatprep.subr.mxu0 %v2620_v0 }
0x10bd   :  { %2343 = vmatprep.mubr.msk.f32.mxu0 %vm205_vm5, %v1084_v32  ;;  %2376 = vmatpush3.msra.mxu0 %v2914_v51 }
0x10be   :  { %2377 = vmatprep.subr.mxu0 %v2620_v0 }
0x10bf   :  { %2378 = vmatpush3.msra.mxu0 %v2918_v52 }
0x10c0   :  { %2344 = vmatmul.mubr.msk.f32.gmra.mxu0 %vm205_vm5, %v1085_v33  ;;  %2393 = vmatprep.subr.mxu0 %v2620_v0 }
0x1170   :  { %v934_v35 = vpop.f32.mrf.mxu0 }
0x1171   :  { %v938_v36 = vadd.f32 %v934_v35, %v184_v34 }
0x1172   :  { %v2317_v37 = vpop.f32.mrf.mxu0 }
0x1173   :  { %v2099_v38 = vmul.f32 -1.442695, %v938_v36 }
0x1175   :  { %2493 = vpow2.f32 %v2099_v38 }
0x1176   :  { %2495 = vtanh.f32 %v938_v36 }
0x1178   :  { %v2950_v58 = vpop.f32.mrf.mxu0 }
0x1179   :  { %v1195_v36 = vadd.f32 %v2950_v58, %v2955_v4 }
0x117a   :  { %v1189_v3 = vpop.f32.mrf.mxu0 }
0x117b   :  { %v1190_v2 = vadd.f32 %v2955_v4, %v1189_v3 }
0x1182   :  { %v2494_v39 = vpop.eup %2493 }
0x1183   :  { %v943_v40 = vadd.f32 1.0, %v2494_v39  ;;  %v2496_v41 = vpop.eup %2495 }
0x1185   :  { %2497 = vrcp.f32 %v943_v40 }
0x1192   :  { %v2498_v42 = vpop.eup %2497 }
0x1193   :  { %v946_v43 = vsel %vm2736_vm4, %v2496_v41, %v2498_v42 }
0x1194   :  { %949 = vrot.lane.b32.xlu0 %v946_v43, %s2622_s3  ;;  %v947_v63 = vmul.f32 %v946_v43, %v847_v18 }
0x1206   :  { %v950_v44 = vpop.permute.xlu0 %949 }
0x1207   :  { %v952_v45 = vmul.f32 %v950_v44, %v946_v43 }
0x1209   :  { %954 = vrot.lane.b32.xlu1 %v952_v45, %s2623_s21 }
0x127b   :  { %v955_v46 = vpop.permute.xlu1 %954 }
0x127c   :  { %v2903_v47 = vadd.f32 %v955_v46, %v947_v63 }
0x127e   :  { %2499 = vtanh.f32 %v2903_v47 }
0x128b   :  { %v2500_v48 = vpop.eup %2499 }
0x128c   :  { %960 = vrot.lane.b32.xlu0 %v2500_v48, %s2622_s3 }
0x12fe   :  { %v961_v53 = vpop.permute.xlu0 %960 }
0x12ff   :  { %v963_v54 = vmul.f32 %v961_v53, %v946_v43 }
0x1301   :  { %965 = vrot.lane.b32.xlu1 %v963_v54, %s2623_s21 }
0x1373   :  { %v966_v55 = vpop.permute.xlu1 %965 }
0x1374   :  { %969 = vst.msk [vmem:[#allocation3 + $0x30] sm:$0xff] %vm205_vm5, %v966_v55  ;;  %2327 = vmatmul.mubr.msk.f32.vlgmr.msra.gmra.mxu1 %vm205_vm5, %v966_v55 }
0x1375   :  { %2350 = vmatpush3.msra.mxu1 %v2907_v49  ;;  %2357 = vmatprep.mubr.msk.f32.mxu1 %vm2621_vm0, %v2620_v0 }
0x1376   :  { %2351 = vmatprep.subr.mxu1 %v2620_v0 }
0x1377   :  { %2352 = vmatpush3.msra.mxu1 %v2910_v50 }
0x1378   :  { %2353 = vmatprep.subr.mxu1 %v2620_v0 }
0x1379   :  { %2354 = vmatpush3.msra.mxu1 %v2914_v51 }
0x137a   :  { %2355 = vmatprep.subr.mxu1 %v2620_v0 }
0x137b   :  { %2356 = vmatpush3.msra.mxu1 %v2918_v52  ;;  %v1086_v56 = vld [vmem:[#allocation3 + $0x30] sm:$0xff] }
0x137c   :  { %2358 = vmatmul.mubr.f32.vlgmr.msra.gmra.mxu1 %v2620_v0  ;;  %2346 = vmatprep.mubr.msk.f32.mxu0 %vm205_vm5, %v1086_v56 }
0x137d   :  { %2360 = vmatprep.subr.mxu1 %v2620_v0  ;;  %2368 = vmatprep.mubr.msk.f32.mxu1 %vm2621_vm0, %v2620_v0 }
0x137e   :  { %2361 = vmatpush3.msra.mxu1 %v2907_v49 }
0x137f   :  { %2362 = vmatprep.subr.mxu1 %v2620_v0 }
0x1380   :  { %2363 = vmatpush3.msra.mxu1 %v2910_v50 }
0x1381   :  { %2364 = vmatprep.subr.mxu1 %v2620_v0 }
0x1382   :  { %2365 = vmatpush3.msra.mxu1 %v2914_v51 }
0x1383   :  { %2366 = vmatprep.subr.mxu1 %v2620_v0 }
0x1384   :  { %2367 = vmatpush3.msra.mxu1 %v2918_v52 }
0x1385   :  { %2382 = vmatprep.subr.mxu1 %v2620_v0 }
0x1434   :  { %v1044_v59 = vpop.f32.mrf.mxu1 }
0x1435   :  { %v1048_v61 = vadd.f32 %v1044_v59, %v189_v57 }
0x1436   :  { %v2328_v1 = vpop.f32.mrf.mxu1 }
0x1437   :  { %v2101_v7 = vmul.f32 -1.442695, %v1048_v61 }
0x143c   :  { %v1307_v8 = vpop.f32.mrf.mxu1 }
0x143d   :  { %v1311_v10 = vadd.f32 %v1307_v8, %v1190_v2 }
0x143e   :  { %v2359_v11 = vpop.f32.mrf.mxu1 }
0x143f   :  { %v2111_v12 = vmul.f32 -1.442695, %v1311_v10 }
0x1441   :  { %2501 = vpow2.f32 %v2111_v12 }
0x1442   :  { %2503 = vtanh.f32 %v1311_v10 }
0x144e   :  { %v2502_v13 = vpop.eup %2501 }
0x144f   :  { %v1316_v9 = vadd.f32 1.0, %v2502_v13  ;;  %v2504_v62 = vpop.eup %2503 }
0x1451   :  { %2505 = vrcp.f32 %v1316_v9 }
0x1452   :  { %2507 = vpow2.f32 %v2101_v7 }
0x145e   :  { %v2506_v5 = vpop.eup %2505 }
0x145f   :  { %v1319_v14 = vsel %vm2736_vm4, %v2504_v62, %v2506_v5  ;;  %v2508_v16 = vpop.eup %2507 }
0x1460   :  { %1322 = vrot.lane.b32.xlu0 %v1319_v14, %s2622_s3  ;;  %v1320_v60 = vmul.f32 0.0, %v1319_v14  ;;  %v1053_v17 = vadd.f32 1.0, %v2508_v16 }
0x14d2   :  { %v1323_v6 = vpop.permute.xlu0 %1322 }
0x14d3   :  { %v1325_v15 = vmul.f32 %v1323_v6, %v1319_v14 }
0x14d5   :  { %1327 = vrot.lane.b32.xlu1 %v1325_v15, %s2623_s21 }
0x1547   :  { %v1328_v18 = vpop.permute.xlu1 %1327 }
0x1548   :  { %v1330_v19 = vadd.f32 %v1328_v18, %v1320_v60 }
0x154a   :  { %2509 = vtanh.f32 %v1330_v19 }
0x154b   :  { %2511 = vrcp.f32 %v1053_v17 }
0x154c   :  { %2513 = vtanh.f32 %v1048_v61  ;;  %v2342_v61 = vpop.f32.mrf.mxu0 }
0x154e   :  { %v1199_v1 = vpop.f32.mrf.mxu0 }
0x154f   :  { %v1200_v11 = vadd.f32 %v2955_v4, %v1199_v1 }
0x1550   :  { %v3005_v3 = vpop.f32.mrf.mxu0 }
0x1552   :  { %v3007_v2 = vpop.f32.mrf.mxu0 }
0x1557   :  { %v2510_v21 = vpop.eup %2509 }
0x1558   :  { %v2512_v22 = vpop.eup %2511  ;;  %1333 = vrot.lane.b32.xlu0 %v2510_v21, %s2622_s3 }
0x1559   :  { %v2514_v23 = vpop.eup %2513 }
0x155a   :  { %v1056_v24 = vsel %vm2736_vm4, %v2514_v23, %v2512_v22 }
0x155b   :  { %v1057_v30 = vmul.f32 %v1056_v24, %v2903_v47 }
0x155c   :  { %1059 = vrot.lane.b32.xlu0 %v1056_v24, %s2622_s3 }
0x15ca   :  { %v1334_v25 = vpop.permute.xlu0 %1333 }
0x15cb   :  { %v1336_v26 = vmul.f32 %v1334_v25, %v1319_v14  ;;  %v1205_v25 = vadd.f32 %v2342_v61, %v2955_v4 }
0x15cd   :  { %1340 = vrot.lane.b32.xlu1 %v1336_v26, %s2623_s21 }
0x15ce   :  { %v1060_v27 = vpop.permute.xlu0 %1059 }
0x15cf   :  { %v1062_v28 = vmul.f32 %v1060_v27, %v1056_v24 }
0x15d1   :  { %1064 = vrot.lane.b32.xlu0 %v1062_v28, %s2623_s21 }
0x163f   :  { %v1341_v29 = vpop.permute.xlu1 %1340 }
0x1640   :  { %2369 = vmatmul.mubr.msk.f32.vlgmr.msra.gmra.mxu1 %vm205_vm5, %v1341_v29 }
0x1641   :  { %2383 = vmatpush3.msra.mxu1 %v2907_v49  ;;  %2390 = vmatprep.mubr.msk.f32.mxu1 %vm2621_vm0, %v2620_v0 }
0x1642   :  { %2384 = vmatprep.subr.mxu1 %v2620_v0 }
0x1643   :  { %v1065_v31 = vpop.permute.xlu0 %1064  ;;  %2385 = vmatpush3.msra.mxu1 %v2910_v50 }
0x1644   :  { %v1067_v32 = vadd.f32 %v1065_v31, %v1057_v30  ;;  %2386 = vmatprep.subr.mxu1 %v2620_v0 }
0x1645   :  { %2387 = vmatpush3.msra.mxu1 %v2914_v51 }
0x1646   :  { %2515 = vtanh.f32 %v1067_v32  ;;  %2388 = vmatprep.subr.mxu1 %v2620_v0 }
0x1647   :  { %2389 = vmatpush3.msra.mxu1 %v2918_v52 }
0x1648   :  { %2404 = vmatprep.subr.mxu1 %v2620_v0 }
0x1653   :  { %v2516_v33 = vpop.eup %2515 }
0x1654   :  { %1070 = vrot.lane.b32.xlu0 %v2516_v33, %s2622_s3 }
0x16c6   :  { %v1071_v34 = vpop.permute.xlu0 %1070 }
0x16c7   :  { %v1073_v35 = vmul.f32 %v1071_v34, %v1056_v24 }
0x16c9   :  { %1075 = vrot.lane.b32.xlu0 %v1073_v35, %s2623_s21 }
0x1700   :  { %v1410_v37 = vpop.f32.mrf.mxu1 }
0x1701   :  { %v1414_v38 = vadd.f32 %v1410_v37, %v1195_v36 }
0x1702   :  { %v2370_v39 = vpop.f32.mrf.mxu1 }
0x1703   :  { %v2113_v40 = vmul.f32 -1.442695, %v1414_v38 }
0x1705   :  { %2517 = vpow2.f32 %v2113_v40 }
0x1706   :  { %2519 = vtanh.f32 %v1414_v38 }
0x1712   :  { %v2518_v41 = vpop.eup %2517 }
0x1713   :  { %v1419_v42 = vadd.f32 1.0, %v2518_v41  ;;  %v2520_v43 = vpop.eup %2519 }
0x1715   :  { %2521 = vrcp.f32 %v1419_v42 }
0x1722   :  { %v2522_v44 = vpop.eup %2521 }
0x1723   :  { %v1422_v45 = vsel %vm2736_vm4, %v2520_v43, %v2522_v44  ;;  %v1210_v44 = vadd.f32 %v2955_v4, %v3007_v2 }
0x1724   :  { %1425 = vrot.lane.b32.xlu1 %v1422_v45, %s2622_s3  ;;  %v1423_v53 = vmul.f32 %v1422_v45, %v1330_v19 }
0x173b   :  { %v1076_v63 = vpop.permute.xlu0 %1075 }
0x173c   :  { %1079 = vst.msk [vmem:[#allocation3 + $0x38] sm:$0xff] %vm205_vm5, %v1076_v63 }
0x1743   :  { %v1087_v46 = vld [vmem:[#allocation3 + $0x38] sm:$0xff] }
0x1744   :  { %2347 = vmatmul.mubr.msk.f32.gmra.mxu0 %vm205_vm5, %v1087_v46 }
0x1745   :  { %2379 = vmatprep.mubr.msk.f32.mxu0 %vm2621_vm0, %v2620_v0 }
0x1796   :  { %v1426_v47 = vpop.permute.xlu1 %1425 }
0x1797   :  { %v1428_v48 = vmul.f32 %v1426_v47, %v1422_v45 }
0x1799   :  { %1430 = vrot.lane.b32.xlu1 %v1428_v48, %s2623_s21 }
0x1804   :  { %v3009_v8 = vpop.f32.mrf.mxu0 }
0x1806   :  { %v3011_v10 = vpop.f32.mrf.mxu0 }
0x180b   :  { %v1431_v54 = vpop.permute.xlu1 %1430 }
0x180c   :  { %v1433_v55 = vadd.f32 %v1431_v54, %v1423_v53 }
0x180e   :  { %2523 = vtanh.f32 %v1433_v55 }
0x181b   :  { %v2524_v56 = vpop.eup %2523 }
0x181c   :  { %1436 = vrot.lane.b32.xlu1 %v2524_v56, %s2622_s3 }
0x188e   :  { %v1437_v57 = vpop.permute.xlu1 %1436 }
0x188f   :  { %v1439_v58 = vmul.f32 %v1437_v57, %v1422_v45 }
0x1891   :  { %1443 = vrot.lane.b32.xlu1 %v1439_v58, %s2623_s21 }
0x1903   :  { %v1444_v59 = vpop.permute.xlu1 %1443 }
0x1904   :  { %2380 = vmatmul.mubr.msk.f32.vlgmr.msra.gmra.mxu0 %vm205_vm5, %v1444_v59 }
0x1905   :  { %2394 = vmatpush3.msra.mxu0 %v2907_v49  ;;  %2401 = vmatprep.mubr.msk.f32.mxu0 %vm2621_vm0, %v2620_v0 }
0x1906   :  { %2395 = vmatprep.subr.mxu0 %v2620_v0 }
0x1907   :  { %2396 = vmatpush3.msra.mxu0 %v2910_v50 }
0x1908   :  { %2397 = vmatprep.subr.mxu0 %v2620_v0 }
0x1909   :  { %2398 = vmatpush3.msra.mxu0 %v2914_v51 }
0x190a   :  { %2399 = vmatprep.subr.mxu0 %v2620_v0 }
0x190b   :  { %2400 = vmatpush3.msra.mxu0 %v2918_v52 }
0x190c   :  { %2415 = vmatprep.subr.mxu0 %v2620_v0 }
0x19c4   :  { %v1513_v12 = vpop.f32.mrf.mxu0 }
0x19c5   :  { %v1517_v13 = vadd.f32 %v1513_v12, %v1200_v11 }
0x19c6   :  { %v2381_v9 = vpop.f32.mrf.mxu0 }
0x19c7   :  { %v2115_v62 = vmul.f32 -1.442695, %v1517_v13  ;;  %v1215_v9 = vadd.f32 %v3005_v3, %v2955_v4 }
0x19c9   :  { %2525 = vpow2.f32 %v2115_v62 }
0x19ca   :  { %2527 = vtanh.f32 %v1517_v13 }
0x19d6   :  { %v2526_v5 = vpop.eup %2525 }
0x19d7   :  { %v1522_v14 = vadd.f32 1.0, %v2526_v5  ;;  %v2528_v6 = vpop.eup %2527 }
0x19d9   :  { %2529 = vrcp.f32 %v1522_v14 }
0x19e6   :  { %v2530_v15 = vpop.eup %2529 }
0x19e7   :  { %v1525_v7 = vsel %vm2736_vm4, %v2528_v6, %v2530_v15 }
0x19e8   :  { %1528 = vrot.lane.b32.xlu0 %v1525_v7, %s2622_s3  ;;  %v1526_v17 = vmul.f32 %v1525_v7, %v1433_v55 }
0x1a5a   :  { %v1529_v16 = vpop.permute.xlu0 %1528 }
0x1a5b   :  { %v1531_v60 = vmul.f32 %v1529_v16, %v1525_v7 }
0x1a5d   :  { %1533 = vrot.lane.b32.xlu1 %v1531_v60, %s2623_s21 }
0x1acf   :  { %v1534_v18 = vpop.permute.xlu1 %1533 }
0x1ad0   :  { %v1536_v19 = vadd.f32 %v1534_v18, %v1526_v17 }
0x1ad2   :  { %2531 = vtanh.f32 %v1536_v19 }
0x1adf   :  { %v2532_v21 = vpop.eup %2531 }
0x1ae0   :  { %1539 = vrot.lane.b32.xlu0 %v2532_v21, %s2622_s3 }
0x1b52   :  { %v1540_v22 = vpop.permute.xlu0 %1539 }
0x1b53   :  { %v1542_v23 = vmul.f32 %v1540_v22, %v1525_v7  ;;  %v1220_v22 = vadd.f32 %v2955_v4, %v3011_v10 }
0x1b55   :  { %1546 = vrot.lane.b32.xlu1 %v1542_v23, %s2623_s21 }
0x1bc7   :  { %v1547_v24 = vpop.permute.xlu1 %1546 }
0x1bc8   :  { %2391 = vmatmul.mubr.msk.f32.vlgmr.msra.gmra.mxu1 %vm205_vm5, %v1547_v24 }
0x1bc9   :  { %2405 = vmatpush3.msra.mxu1 %v2907_v49  ;;  %2412 = vmatprep.mubr.msk.f32.mxu1 %vm2621_vm0, %v2620_v0 }
0x1bca   :  { %2406 = vmatprep.subr.mxu1 %v2620_v0 }
0x1bcb   :  { %2407 = vmatpush3.msra.mxu1 %v2910_v50 }
0x1bcc   :  { %2408 = vmatprep.subr.mxu1 %v2620_v0 }
0x1bcd   :  { %2409 = vmatpush3.msra.mxu1 %v2914_v51 }
0x1bce   :  { %2410 = vmatprep.subr.mxu1 %v2620_v0 }
0x1bcf   :  { %2411 = vmatpush3.msra.mxu1 %v2918_v52 }
0x1bd0   :  { %2426 = vmatprep.subr.mxu1 %v2620_v0 }
0x1c88   :  { %v1616_v26 = vpop.f32.mrf.mxu1 }
0x1c89   :  { %v1620_v27 = vadd.f32 %v1616_v26, %v1205_v25 }
0x1c8a   :  { %v2392_v28 = vpop.f32.mrf.mxu1 }
0x1c8b   :  { %v2117_v29 = vmul.f32 -1.442695, %v1620_v27 }
0x1c8d   :  { %2533 = vpow2.f32 %v2117_v29 }
0x1c8e   :  { %2535 = vtanh.f32 %v1620_v27 }
0x1c9a   :  { %v2534_v30 = vpop.eup %2533 }
0x1c9b   :  { %v1625_v31 = vadd.f32 1.0, %v2534_v30  ;;  %v2536_v32 = vpop.eup %2535 }
0x1c9d   :  { %2537 = vrcp.f32 %v1625_v31 }
0x1caa   :  { %v2538_v33 = vpop.eup %2537 }
0x1cab   :  { %v1628_v34 = vsel %vm2736_vm4, %v2536_v32, %v2538_v33 }
0x1cac   :  { %1631 = vrot.lane.b32.xlu0 %v1628_v34, %s2622_s3  ;;  %v1629_v37 = vmul.f32 %v1628_v34, %v1536_v19 }
0x1d1e   :  { %v1632_v35 = vpop.permute.xlu0 %1631 }
0x1d1f   :  { %v1634_v36 = vmul.f32 %v1632_v35, %v1628_v34 }
0x1d21   :  { %1636 = vrot.lane.b32.xlu1 %v1634_v36, %s2623_s21 }
0x1d93   :  { %v1637_v38 = vpop.permute.xlu1 %1636 }
0x1d94   :  { %v1639_v39 = vadd.f32 %v1637_v38, %v1629_v37 }
0x1d96   :  { %2539 = vtanh.f32 %v1639_v39 }
0x1da3   :  { %v2540_v40 = vpop.eup %2539 }
0x1da4   :  { %1642 = vrot.lane.b32.xlu0 %v2540_v40, %s2622_s3  ;;  %v1225_v40 = vadd.f32 %v3009_v8, %v2955_v4 }
0x1e16   :  { %v1643_v41 = vpop.permute.xlu0 %1642 }
0x1e17   :  { %v1645_v42 = vmul.f32 %v1643_v41, %v1628_v34 }
0x1e19   :  { %1649 = vrot.lane.b32.xlu1 %v1645_v42, %s2623_s21 }
0x1e8b   :  { %v1650_v43 = vpop.permute.xlu1 %1649 }
0x1e8c   :  { %2402 = vmatmul.mubr.msk.f32.vlgmr.msra.gmra.mxu0 %vm205_vm5, %v1650_v43 }
0x1e8d   :  { %2416 = vmatpush3.msra.mxu0 %v2907_v49  ;;  %2423 = vmatprep.mubr.msk.f32.mxu0 %vm2621_vm0, %v2620_v0 }
0x1e8e   :  { %2417 = vmatprep.subr.mxu0 %v2620_v0 }
0x1e8f   :  { %2418 = vmatpush3.msra.mxu0 %v2910_v50 }
0x1e90   :  { %2419 = vmatprep.subr.mxu0 %v2620_v0 }
0x1e91   :  { %2420 = vmatpush3.msra.mxu0 %v2914_v51 }
0x1e92   :  { %2421 = vmatprep.subr.mxu0 %v2620_v0 }
0x1e93   :  { %2422 = vmatpush3.msra.mxu0 %v2918_v52 }
0x1f4c   :  { %v1719_v45 = vpop.f32.mrf.mxu0 }
0x1f4d   :  { %v1723_v63 = vadd.f32 %v1719_v45, %v1210_v44 }
0x1f4e   :  { %v2403_v46 = vpop.f32.mrf.mxu0 }
0x1f4f   :  { %v2119_v47 = vmul.f32 -1.442695, %v1723_v63 }
0x1f51   :  { %2541 = vpow2.f32 %v2119_v47 }
0x1f52   :  { %2543 = vtanh.f32 %v1723_v63 }
0x1f5e   :  { %v2542_v48 = vpop.eup %2541 }
0x1f5f   :  { %v1728_v53 = vadd.f32 1.0, %v2542_v48  ;;  %v2544_v54 = vpop.eup %2543 }
0x1f61   :  { %2545 = vrcp.f32 %v1728_v53 }
0x1f6e   :  { %v2546_v55 = vpop.eup %2545 }
0x1f6f   :  { %v1731_v56 = vsel %vm2736_vm4, %v2544_v54, %v2546_v55 }
0x1f70   :  { %1734 = vrot.lane.b32.xlu0 %v1731_v56, %s2622_s3  ;;  %v1732_v59 = vmul.f32 %v1731_v56, %v1639_v39 }
0x1fe2   :  { %v1735_v57 = vpop.permute.xlu0 %1734 }
0x1fe3   :  { %v1737_v58 = vmul.f32 %v1735_v57, %v1731_v56 }
0x1fe5   :  { %1739 = vrot.lane.b32.xlu1 %v1737_v58, %s2623_s21 }
0x2057   :  { %v1740_v61 = vpop.permute.xlu1 %1739 }
0x2058   :  { %v1742_v1 = vadd.f32 %v1740_v61, %v1732_v59 }
0x205a   :  { %2547 = vtanh.f32 %v1742_v1 }
0x2067   :  { %v2548_v2 = vpop.eup %2547 }
0x2068   :  { %1745 = vrot.lane.b32.xlu0 %v2548_v2, %s2622_s3 }
0x20da   :  { %v1746_v11 = vpop.permute.xlu0 %1745 }
0x20db   :  { %v1748_v12 = vmul.f32 %v1746_v11, %v1731_v56 }
0x20dd   :  { %1752 = vrot.lane.b32.xlu1 %v1748_v12, %s2623_s21 }
0x214f   :  { %v1753_v13 = vpop.permute.xlu1 %1752 }
0x2150   :  { %2413 = vmatmul.mubr.msk.f32.vlgmr.msra.gmra.mxu1 %vm205_vm5, %v1753_v13 }
0x2151   :  { %2427 = vmatpush3.msra.mxu1 %v2907_v49  ;;  %2434 = vmatprep.mubr.msk.f32.mxu1 %vm2621_vm0, %v2620_v0 }
0x2152   :  { %2428 = vmatprep.subr.mxu1 %v2620_v0 }
0x2153   :  { %2429 = vmatpush3.msra.mxu1 %v2910_v50 }
0x2154   :  { %2430 = vmatprep.subr.mxu1 %v2620_v0 }
0x2155   :  { %2431 = vmatpush3.msra.mxu1 %v2914_v51 }
0x2156   :  { %2432 = vmatprep.subr.mxu1 %v2620_v0 }
0x2157   :  { %2433 = vmatpush3.msra.mxu1 %v2918_v52 }
0x2210   :  { %v1822_v62 = vpop.f32.mrf.mxu1 }
0x2211   :  { %v1826_v49 = vadd.f32 %v1822_v62, %v1215_v9 }
0x2212   :  { %v2414_v5 = vpop.f32.mrf.mxu1 }
0x2213   :  { %v2121_v14 = vmul.f32 -1.442695, %v1826_v49 }
0x2215   :  { %2549 = vpow2.f32 %v2121_v14 }
0x2216   :  { %2551 = vtanh.f32 %v1826_v49 }
0x2222   :  { %v2550_v6 = vpop.eup %2549 }
0x2223   :  { %v1831_v15 = vadd.f32 1.0, %v2550_v6  ;;  %v2552_v50 = vpop.eup %2551 }
0x2225   :  { %2553 = vrcp.f32 %v1831_v15 }
0x2232   :  { %v2554_v7 = vpop.eup %2553 }
0x2233   :  { %v1834_v51 = vsel %vm2736_vm4, %v2552_v50, %v2554_v7 }
0x2234   :  { %1837 = vrot.lane.b32.xlu0 %v1834_v51, %s2622_s3  ;;  %v1835_v3 = vmul.f32 %v1834_v51, %v1742_v1 }
0x22a6   :  { %v1838_v0 = vpop.permute.xlu0 %1837 }
0x22a7   :  { %v1840_v52 = vmul.f32 %v1838_v0, %v1834_v51 }
0x22a9   :  { %1842 = vrot.lane.b32.xlu1 %v1840_v52, %s2623_s21 }
0x231b   :  { %v1843_v16 = vpop.permute.xlu1 %1842 }
0x231c   :  { %v1845_v60 = vadd.f32 %v1843_v16, %v1835_v3 }
0x231e   :  { %2555 = vtanh.f32 %v1845_v60 }
0x232b   :  { %v2556_v17 = vpop.eup %2555 }
0x232c   :  { %1848 = vrot.lane.b32.xlu0 %v2556_v17, %s2622_s3 }
0x239e   :  { %v1849_v18 = vpop.permute.xlu0 %1848 }
0x239f   :  { %v1851_v19 = vmul.f32 %v1849_v18, %v1834_v51 }
0x23a1   :  { %1855 = vrot.lane.b32.xlu1 %v1851_v19, %s2623_s21 }
0x2413   :  { %v1856_v21 = vpop.permute.xlu1 %1855 }
0x2414   :  { %2424 = vmatmul.mubr.msk.f32.vlgmr.msra.gmra.mxu0 %vm205_vm5, %v1856_v21 }
0x24d4   :  { %v1925_v23 = vpop.f32.mrf.mxu0 }
0x24d5   :  { %v1929_v24 = vadd.f32 %v1925_v23, %v1220_v22 }
0x24d6   :  { %v2425_v25 = vpop.f32.mrf.mxu0 }
0x24d7   :  { %v2123_v26 = vmul.f32 -1.442695, %v1929_v24 }
0x24d9   :  { %2557 = vpow2.f32 %v2123_v26 }
0x24da   :  { %2559 = vtanh.f32 %v1929_v24 }
0x24e6   :  { %v2558_v27 = vpop.eup %2557 }
0x24e7   :  { %v1934_v28 = vadd.f32 1.0, %v2558_v27  ;;  %v2560_v29 = vpop.eup %2559 }
0x24e9   :  { %2561 = vrcp.f32 %v1934_v28 }
0x24f6   :  { %v2562_v30 = vpop.eup %2561 }
0x24f7   :  { %v1937_v31 = vsel %vm2736_vm4, %v2560_v29, %v2562_v30 }
0x24f8   :  { %1940 = vrot.lane.b32.xlu0 %v1937_v31, %s2622_s3  ;;  %v1938_v10 = vmul.f32 %v1937_v31, %v1845_v60 }
0x256a   :  { %v1941_v32 = vpop.permute.xlu0 %1940 }
0x256b   :  { %v1943_v33 = vmul.f32 %v1941_v32, %v1937_v31 }
0x256d   :  { %1945 = vrot.lane.b32.xlu1 %v1943_v33, %s2623_s21 }
0x25df   :  { %v1946_v34 = vpop.permute.xlu1 %1945 }
0x25e0   :  { %v1948_v35 = vadd.f32 %v1946_v34, %v1938_v10 }
0x25e2   :  { %2563 = vtanh.f32 %v1948_v35 }
0x25ef   :  { %v2564_v36 = vpop.eup %2563 }
0x25f0   :  { %1951 = vrot.lane.b32.xlu0 %v2564_v36, %s2622_s3 }
0x2662   :  { %v1952_v37 = vpop.permute.xlu0 %1951 }
0x2663   :  { %v1954_v38 = vmul.f32 %v1952_v37, %v1937_v31 }
0x2665   :  { %1958 = vrot.lane.b32.xlu1 %v1954_v38, %s2623_s21 }
0x26d7   :  { %v1959_v39 = vpop.permute.xlu1 %1958 }
0x26d8   :  { %2435 = vmatmul.mubr.msk.f32.vlgmr.msra.gmra.mxu1 %vm205_vm5, %v1959_v39 }
0x2798   :  { %v2028_v41 = vpop.f32.mrf.mxu1 }
0x2799   :  { %v2032_v42 = vadd.f32 %v2028_v41, %v1225_v40 }
0x279a   :  { %v2436_v43 = vpop.f32.mrf.mxu1 }
0x279b   :  { %v2125_v44 = vmul.f32 -1.442695, %v2032_v42 }
0x279d   :  { %2565 = vpow2.f32 %v2125_v44 }
0x279e   :  { %2567 = vtanh.f32 %v2032_v42 }
0x27aa   :  { %v2566_v45 = vpop.eup %2565 }
0x27ab   :  { %v2037_v63 = vadd.f32 1.0, %v2566_v45  ;;  %v2568_v46 = vpop.eup %2567 }
0x27ad   :  { %2569 = vrcp.f32 %v2037_v63 }
0x27ba   :  { %v2570_v47 = vpop.eup %2569 }
0x27bb   :  { %v2040_v48 = vsel %vm2736_vm4, %v2568_v46, %v2570_v47 }
0x27bc   :  { %2043 = vrot.lane.b32.xlu0 %v2040_v48, %s2622_s3  ;;  %v2041_v4 = vmul.f32 %v2040_v48, %v1948_v35 }
0x282e   :  { %v2044_v53 = vpop.permute.xlu0 %2043 }
0x282f   :  { %v2046_v54 = vmul.f32 %v2044_v53, %v2040_v48 }
0x2831   :  { %2048 = vrot.lane.b32.xlu1 %v2046_v54, %s2623_s21 }
0x28a3   :  { %v2049_v8 = vpop.permute.xlu1 %2048 }
0x28a4   :  { %v2051_v55 = vadd.f32 %v2049_v8, %v2041_v4 }
0x28a6   :  { %2571 = vtanh.f32 %v2051_v55 }
0x28b3   :  { %v2572_v56 = vpop.eup %2571 }
0x28b4   :  { %2054 = vrot.lane.b32.xlu0 %v2572_v56, %s2622_s3 }
0x2926   :  { %v2055_v57 = vpop.permute.xlu0 %2054 }
0x2927   :  { %v2057_v58 = vmul.f32 %v2055_v57, %v2040_v48 }
0x2929   :  { %2059 = vrot.lane.b32.xlu1 %v2057_v58, %s2623_s21 }
0x299b   :  { %v2060_v20 = vpop.permute.xlu1 %2059 }
0x299c   :  { %2062 = vst.msk [vmem:[#allocation8] sm:$0xff] %vm205_vm5, %v2060_v20 }
0x299d   :  { %2604 = shalt.err (!%p2601_p9)
}
0x299e   :  { %2072 = dma.vmem_to_hbm [thread:$0]  %s2070_s17, 128, %s3103_s7, [#allocation7]  }
0x299f   :  { %2615 = dma.done.wait [#allocation7], 128  }
0x29a0   :  { %2616 = vsyncadd [#allocation7], 4294967168 }
0x29a1   :  { %2076 = vsyncpa [#allocation6], 1 }
0x29a2   :  { %2077 = vsyncpa [#allocation7], 1 }

</bundles_post_ra>
